<compile_context>
chip_gen: v7x
topology: tpu7x:2x2x1
jax: 0.10.0
libtpu: 0.0.40
codegen_flags: <defaults>
</compile_context>

<pallas_src>
import jax
import jax.numpy as jnp
from jax import lax
from jax.experimental import pallas as pl
from jax.experimental.pallas import tpu as pltpu

# ----------------------------- configuration -----------------------------
B = 2
IN_CHANS = 3
IMG = 16
PATCH = 8
NUM_PATCHES = (IMG // PATCH) * (IMG // PATCH)   # 4
SEQ = NUM_PATCHES + 1                           # 5 (cls token)
TOKENS = B * SEQ                                # 10 rows: [cls_0, cls_1, patches_0, patches_1]
EMBED = 64
NUM_HEADS = 2
HEAD_DIM = EMBED // NUM_HEADS                   # 32
MLP_HIDDEN = 4 * EMBED                          # 256
DEPTH = 2
NUM_CLASSES = 10
LN_EPS = 1e-6                                   # timm ViT uses eps=1e-6
PATCH_DIM = IN_CHANS * PATCH * PATCH            # 192
NEG_INF = -1e30

HEAD_PAD = 128                                  # lane-dense head / output width

# packed per-layer matmul-weight slab (bf16); column offsets are 128-aligned
QKV_OFF = 0                                     # (D, 3D) fused qkv (Q scale folded)
PROJ_OFF = 256                                  # (D, D)  attention out-proj
FC1_OFF = 384                                   # (D, 4D) mlp fc1
LMATS_COLS = FC1_OFF + MLP_HIDDEN               # 640

# packed per-layer vector slab (f32) row ids
(ROW_LN1W, ROW_LN1B, ROW_QKVB, ROW_PROJB,
 ROW_LN2W, ROW_LN2B, ROW_FC1B, ROW_FC2B) = range(8)
LVECS_ROWS = 8
LVECS_COLS = MLP_HIDDEN                         # 256 (widest vector)

TOKSLAB_COLS = 128                              # [ tok_bias(64) | mask(10) | pad ]


# ----------------------------- in-kernel math -----------------------------
def _erf(x):
    # TODO(synk): lax.erf lowering availability on Mosaic varies by version; use a
    # float32-accurate rational approximation (A&S 7.1.26, |err| < 1.5e-7) instead.
    a1, a2, a3, a4, a5 = 0.254829592, -0.284496736, 1.421413741, -1.453152027, 1.061405429
    p = 0.3275911
    s = jnp.where(x >= 0.0, 1.0, -1.0)
    ax = jnp.abs(x)
    t = 1.0 / (1.0 + p * ax)
    poly = ((((a5 * t + a4) * t + a3) * t + a2) * t + a1) * t
    return s * (1.0 - poly * jnp.exp(-ax * ax))


def _gelu(x):
    # erf-based GELU, matching torch.nn.GELU(approximate='none'); f32 on the VPU/EUP
    return 0.5 * x * (1.0 + _erf(x * 0.7071067811865476))


def _layernorm(x, w, b, eps=LN_EPS):
    mu = jnp.mean(x, axis=-1, keepdims=True)
    xc = x - mu
    var = jnp.mean(xc * xc, axis=-1, keepdims=True)
    return xc * lax.rsqrt(var + eps) * w + b


# ----------------------------- fused Pallas kernel -----------------------------
def _vit_fused_kernel(
    patches_ref,     # (TOKENS, PATCH_DIM) bf16   cls rows are zero rows
    patch_w_ref,     # (PATCH_DIM, D)      bf16
    tokslab_ref,     # (TOKENS, 128)       f32    [tok_bias | additive mask | pad]
    lmats_a_ref,     # (DEPTH, D, LMATS_COLS) bf16 [qkv | proj | fc1]
    lmats_b_ref,     # (DEPTH, 4D, D)      bf16   fc2
    lvecs_ref,       # (DEPTH, 8, 256)     f32    LN weights + all biases
    head_w_ref,      # (D, 128)            bf16   head weights, zero-padded cols
    fvecs_ref,       # (8, 128)            f32    [norm_w, norm_b, head_b(pad), ...]
    o_ref,           # (B, 128)            f32    lane-dense logits (sliced outside)
):
    tokslab = tokslab_ref[...]
    tok_bias = tokslab[:, 0:EMBED]                       # (TOKENS, D) f32
    mask = tokslab[:, EMBED:EMBED + TOKENS]              # (TOKENS, TOKENS) f32

    # ---- patch embedding + cls/pos assembly (token bias precomputed on host) ----
    x = jnp.dot(patches_ref[...], patch_w_ref[...],
                preferred_element_type=jnp.float32) + tok_bias   # (TOKENS, D) f32

    # ---- DEPTH encoder blocks, fully unrolled (static trip count) ----
    for l in range(DEPTH):
        w_qkv = lmats_a_ref[l, :, QKV_OFF:QKV_OFF + 3 * EMBED]        # (D, 3D) bf16
        w_fc1 = lmats_a_ref[l, :, FC1_OFF:FC1_OFF + MLP_HIDDEN]       # (D, 4D) bf16
        w_fc2 = lmats_b_ref[l]                                        # (4D, D) bf16

        ln1w = lvecs_ref[l, ROW_LN1W:ROW_LN1W + 1, 0:EMBED]
        ln1b = lvecs_ref[l, ROW_LN1B:ROW_LN1B + 1, 0:EMBED]
        qkvb = lvecs_ref[l, ROW_QKVB:ROW_QKVB + 1, 0:3 * EMBED]
        projb = lvecs_ref[l, ROW_PROJB:ROW_PROJB + 1, 0:EMBED]
        ln2w = lvecs_ref[l, ROW_LN2W:ROW_LN2W + 1, 0:EMBED]
        ln2b = lvecs_ref[l, ROW_LN2B:ROW_LN2B + 1, 0:EMBED]
        fc1b = lvecs_ref[l, ROW_FC1B:ROW_FC1B + 1, 0:MLP_HIDDEN]
        fc2b = lvecs_ref[l, ROW_FC2B:ROW_FC2B + 1, 0:EMBED]

        # --- attention branch: x = x + proj(attn(LN1(x))) ---
        h = _layernorm(x, ln1w, ln1b)                                 # f32
        # ONE fused QKV matmul for both heads (scale already folded into Q cols)
        qkv = jnp.dot(h.astype(jnp.bfloat16), w_qkv,
                      preferred_element_type=jnp.float32) + qkvb      # (TOKENS, 3D) f32

        attn = None
        for hd in range(NUM_HEADS):
            q = qkv[:, hd * HEAD_DIM:(hd + 1) * HEAD_DIM]
            k = qkv[:, EMBED + hd * HEAD_DIM:EMBED + (hd + 1) * HEAD_DIM]
            v = qkv[:, 2 * EMBED + hd * HEAD_DIM:2 * EMBED + (hd + 1) * HEAD_DIM]
            # q @ k^T without materializing a transpose (contract on last axes)
            s = lax.dot_general(q, k, (((1,), (1,)), ((), ())),
                                preferred_element_type=jnp.float32) + mask
            s = s - jnp.max(s, axis=-1, keepdims=True)
            p = jnp.exp(s)
            p = p * pl.reciprocal(jnp.sum(p, axis=-1, keepdims=True), approx=True)
            o_h = jnp.dot(p, v, preferred_element_type=jnp.float32)   # (TOKENS, Dh)
            # per-head row block of proj weight -> accumulate (no concat)
            w_proj_h = lmats_a_ref[l, hd * HEAD_DIM:(hd + 1) * HEAD_DIM,
                                   PROJ_OFF:PROJ_OFF + EMBED]         # (Dh, D) bf16
            c = jnp.dot(o_h.astype(jnp.bfloat16), w_proj_h,
                        preferred_element_type=jnp.float32)           # (TOKENS, D)
            attn = c if attn is None else attn + c
        x = x + attn + projb

        # --- MLP branch: x = x + fc2(gelu(fc1(LN2(x)))) ---
        h2 = _layernorm(x, ln2w, ln2b)
        y = jnp.dot(h2.astype(jnp.bfloat16), w_fc1,
                    preferred_element_type=jnp.float32) + fc1b
        y = _gelu(y)
        x = x + jnp.dot(y.astype(jnp.bfloat16), w_fc2,
                        preferred_element_type=jnp.float32) + fc2b

    # ---- final LN on cls tokens (rows 0..B-1) + classification head ----
    norm_w = fvecs_ref[0:1, 0:EMBED]
    norm_b = fvecs_ref[1:2, 0:EMBED]
    head_b = fvecs_ref[2:3, :]                                        # (1, 128)
    cls_tok = x[0:B, :]
    hN = _layernorm(cls_tok, norm_w, norm_b)
    o_ref[...] = jnp.dot(hN.astype(jnp.bfloat16), head_w_ref[...],
                         preferred_element_type=jnp.float32) + head_b


# ----------------------------- glue (plain JAX) -----------------------------
def extract_patches(x, p):
    # NCHW conv with kernel=stride=p  <=>  per-patch flatten in (C, ph, pw) order
    bsz, c, h, w = x.shape
    x = x.reshape(bsz, c, h // p, p, w // p, p)
    x = x.transpose(0, 2, 4, 1, 3, 5)                   # (B, Hp, Wp, C, p, p)
    return x.reshape(bsz, (h // p) * (w // p), c * p * p)


def _vit_forward(prep, x):
    bsz = x.shape[0]
    assert bsz == B, (bsz, B)
    patches = extract_patches(x, PATCH).reshape(bsz * NUM_PATCHES, PATCH_DIM)
    # cls rows are zero rows of the patch matrix: they contribute 0 @ patch_w and
    # get cls_token + pos[0] purely from tok_bias.
    patches_padded = jnp.concatenate(
        [jnp.zeros((bsz, PATCH_DIM), jnp.float32), patches], axis=0
    ).astype(jnp.bfloat16)                               # (TOKENS, PATCH_DIM) bf16

    vspec = pl.BlockSpec(memory_space=pltpu.MemorySpace.VMEM)
    logits_padded = pl.pallas_call(
        _vit_fused_kernel,
        out_shape=jax.ShapeDtypeStruct((B, HEAD_PAD), jnp.float32),
        in_specs=[vspec] * 8,
        out_specs=vspec,
    )(patches_padded,
      prep["patch_w"], prep["tok_slab"],
      prep["lmats_a"], prep["lmats_b"], prep["lvecs"],
      prep["head_w"], prep["fvecs"])
    return logits_padded[:, :NUM_CLASSES]


vit_forward = jax.jit(_vit_forward)


# ----------------------------- host-side weight restructuring -----------------------------
def prepare_params(p):
    """Convert timm-layout params into the fused-kernel layout: fused head-major QKV
    with the 1/sqrt(Dh) scale folded into the Q columns, all per-layer matmul weights
    packed into two bf16 slabs, all small vectors packed into one f32 slab, and the
    cls/pos/patch-bias rows + block-diagonal attention mask precomputed."""
    d, dh = EMBED, HEAD_DIM
    scale = dh ** -0.5

    lmats_a = jnp.zeros((DEPTH, d, LMATS_COLS), jnp.float32)
    lmats_b = jnp.zeros((DEPTH, MLP_HIDDEN, d), jnp.float32)
    lvecs = jnp.zeros((DEPTH, LVECS_ROWS, LVECS_COLS), jnp.float32)
    for l, blk in enumerate(p["blocks"]):
        # timm qkv column order is (3, heads, head_dim): cols 0:D are Q head-major.
        qkv_w = blk["qkv_w"].at[:, 0:d].multiply(scale)       # fold scale into Q
        qkv_b = blk["qkv_b"][0].at[0:d].multiply(scale)
        lmats_a = lmats_a.at[l, :, QKV_OFF:QKV_OFF + 3 * d].set(qkv_w)
        lmats_a = lmats_a.at[l, :, PROJ_OFF:PROJ_OFF + d].set(blk["proj_w"])
        lmats_a = lmats_a.at[l, :, FC1_OFF:FC1_OFF + MLP_HIDDEN].set(blk["fc1_w"])
        lmats_b = lmats_b.at[l].set(blk["fc2_w"])
        lvecs = lvecs.at[l, ROW_LN1W, 0:d].set(blk["ln1_w"][0])
        lvecs = lvecs.at[l, ROW_LN1B, 0:d].set(blk["ln1_b"][0])
        lvecs = lvecs.at[l, ROW_QKVB, 0:3 * d].set(qkv_b)
        lvecs = lvecs.at[l, ROW_PROJB, 0:d].set(blk["proj_b"][0])
        lvecs = lvecs.at[l, ROW_LN2W, 0:d].set(blk["ln2_w"][0])
        lvecs = lvecs.at[l, ROW_LN2B, 0:d].set(blk["ln2_b"][0])
        lvecs = lvecs.at[l, ROW_FC1B, 0:MLP_HIDDEN].set(blk["fc1_b"][0])
        lvecs = lvecs.at[l, ROW_FC2B, 0:d].set(blk["fc2_b"][0])

    # token bias rows: [cls_0, cls_1, patch rows b0, patch rows b1]
    pos = p["pos_embed"][0]                                        # (S, D)
    cls_rows = jnp.broadcast_to(p["cls_token"].reshape(1, d) + pos[0:1], (B, d))
    patch_rows = jnp.tile(pos[1:], (B, 1)) + p["patch_b"]          # (B*N, D), patch_b folded
    tok_bias = jnp.concatenate([cls_rows, patch_rows], axis=0)     # (TOKENS, D)

    idx = jnp.arange(TOKENS)
    row_batch = jnp.where(idx < B, idx, (idx - B) // NUM_PATCHES)
    mask = jnp.where(row_batch[:, None] == row_batch[None, :], 0.0, NEG_INF).astype(jnp.float32)

    tok_slab = jnp.zeros((TOKENS, TOKSLAB_COLS), jnp.float32)
    tok_slab = tok_slab.at[:, 0:d].set(tok_bias)
    tok_slab = tok_slab.at[:, d:d + TOKENS].set(mask)

    head_w = jnp.zeros((d, HEAD_PAD), jnp.float32).at[:, 0:NUM_CLASSES].set(p["head_w"])
    fvecs = jnp.zeros((8, HEAD_PAD), jnp.float32)
    fvecs = fvecs.at[0, 0:d].set(p["norm_w"][0])
    fvecs = fvecs.at[1, 0:d].set(p["norm_b"][0])
    fvecs = fvecs.at[2, 0:NUM_CLASSES].set(p["head_b"][0])

    return {
        "patch_w": p["patch_w"].astype(jnp.bfloat16),
        "tok_slab": tok_slab,
        "lmats_a": lmats_a.astype(jnp.bfloat16),
        "lmats_b": lmats_b.astype(jnp.bfloat16),
        "lvecs": lvecs,
        "head_w": head_w.astype(jnp.bfloat16),
        "fvecs": fvecs,
    }


# ----------------------------- deterministic init (timm layout) -----------------------------
def init_params(key):
    # timm pretrained weights are not loadable here; deterministic synthetic init.
    n_rand = 4 + DEPTH * 4
    keys = iter(jax.random.split(key, n_rand))
    nrm = lambda shape, std=0.02: std * jax.random.normal(next(keys), shape, jnp.float32)

    params = {
        "patch_w": nrm((PATCH_DIM, EMBED)),           # conv(D,C,P,P).reshape(D,-1).T
        "patch_b": jnp.zeros((1, EMBED), jnp.float32),
        "cls_token": nrm((1, 1, EMBED), std=1e-6),
        "pos_embed": nrm((1, SEQ, EMBED)),
        "norm_w": jnp.ones((1, EMBED), jnp.float32),
        "norm_b": jnp.zeros((1, EMBED), jnp.float32),
        "head_w": nrm((EMBED, NUM_CLASSES)),
        "head_b": jnp.zeros((1, NUM_CLASSES), jnp.float32),
        "blocks": [],
    }
    for _ in range(DEPTH):
        params["blocks"].append({
            "ln1_w": jnp.ones((1, EMBED), jnp.float32),
            "ln1_b": jnp.zeros((1, EMBED), jnp.float32),
            "qkv_w": nrm((EMBED, 3 * EMBED)),
            "qkv_b": jnp.zeros((1, 3 * EMBED), jnp.float32),
            "proj_w": nrm((EMBED, EMBED)),
            "proj_b": jnp.zeros((1, EMBED), jnp.float32),
            "ln2_w": jnp.ones((1, EMBED), jnp.float32),
            "ln2_b": jnp.zeros((1, EMBED), jnp.float32),
            "fc1_w": nrm((EMBED, MLP_HIDDEN)),
            "fc1_b": jnp.zeros((1, MLP_HIDDEN), jnp.float32),
            "fc2_w": nrm((MLP_HIDDEN, EMBED)),
            "fc2_b": jnp.zeros((1, EMBED), jnp.float32),
        })
    return params


if __name__ == "__main__":
    root = jax.random.PRNGKey(0)
    k_x, k_p = jax.random.split(root)
    x = jax.random.normal(k_x, (B, IN_CHANS, IMG, IMG), jnp.float32)   # NCHW, like PyTorch
    params = init_params(k_p)
    prep = prepare_params(params)

    logits = vit_forward(prep, x)
    logits = jax.block_until_ready(logits)
    assert logits.shape == (B, NUM_CLASSES), logits.shape
    assert bool(jnp.all(jnp.isfinite(logits)))
    print("KERNEL_OK")
</pallas_src>

<mosaic_0001>
module attributes {stable_mosaic.version = 11 : i64} {
  func.func @_vit_fused_kernel(%arg0: memref<10x192xbf16, #tpu.memory_space<vmem>>, %arg1: memref<192x64xbf16, #tpu.memory_space<vmem>>, %arg2: memref<10x128xf32, #tpu.memory_space<vmem>>, %arg3: memref<2x64x640xbf16, #tpu.memory_space<vmem>>, %arg4: memref<2x256x64xbf16, #tpu.memory_space<vmem>>, %arg5: memref<2x8x256xf32, #tpu.memory_space<vmem>>, %arg6: memref<64x128xbf16, #tpu.memory_space<vmem>>, %arg7: memref<8x128xf32, #tpu.memory_space<vmem>>, %arg8: memref<2x128xf32, #tpu.memory_space<vmem>>) attributes {dimension_semantics = [], scalar_prefetch = 0 : i64, scratch_operands = 0 : i64, tpu.core_type = #tpu.core_type<tc>} {
    %c0 = arith.constant 0 : index
    %c0_0 = arith.constant 0 : index
    %0 = vector.load %arg2[%c0, %c0_0] : memref<10x128xf32, #tpu.memory_space<vmem>>, vector<10x128xf32>
    %1 = vector.extract_strided_slice %0 {offsets = [0, 0], sizes = [10, 64], strides = [1, 1]} : vector<10x128xf32> to vector<10x64xf32>
    %2 = vector.extract_strided_slice %0 {offsets = [0, 64], sizes = [10, 10], strides = [1, 1]} : vector<10x128xf32> to vector<10x10xf32>
    %c0_1 = arith.constant 0 : index
    %c0_2 = arith.constant 0 : index
    %3 = vector.load %arg0[%c0_1, %c0_2] : memref<10x192xbf16, #tpu.memory_space<vmem>>, vector<10x192xbf16>
    %c0_3 = arith.constant 0 : index
    %c0_4 = arith.constant 0 : index
    %4 = vector.load %arg1[%c0_3, %c0_4] : memref<192x64xbf16, #tpu.memory_space<vmem>>, vector<192x64xbf16>
    %cst = arith.constant dense<0.000000e+00> : vector<10x64xf32>
    %5 = tpu.matmul %3, %4, %cst {dimension_numbers = #tpu.dot_dimension_numbers<[1], [0], [0], [1], [0, 0, 1, 1], [], []>} : vector<10x192xbf16>, vector<192x64xbf16>, vector<10x64xf32> -> vector<10x64xf32>
    %6 = arith.addf %5, %1 : vector<10x64xf32>
    %c0_5 = arith.constant 0 : index
    %c0_6 = arith.constant 0 : index
    %c0_7 = arith.constant 0 : index
    %7 = vector.load %arg3[%c0_5, %c0_6, %c0_7] : memref<2x64x640xbf16, #tpu.memory_space<vmem>>, vector<1x64x192xbf16>
    %8 = vector.shape_cast %7 : vector<1x64x192xbf16> to vector<64x192xbf16>
    %c0_8 = arith.constant 0 : index
    %c0_9 = arith.constant 0 : index
    %c384 = arith.constant 384 : index
    %9 = vector.load %arg3[%c0_8, %c0_9, %c384] : memref<2x64x640xbf16, #tpu.memory_space<vmem>>, vector<1x64x256xbf16>
    %10 = vector.shape_cast %9 : vector<1x64x256xbf16> to vector<64x256xbf16>
    %c0_10 = arith.constant 0 : index
    %c0_11 = arith.constant 0 : index
    %c0_12 = arith.constant 0 : index
    %11 = vector.load %arg4[%c0_10, %c0_11, %c0_12] : memref<2x256x64xbf16, #tpu.memory_space<vmem>>, vector<1x256x64xbf16>
    %12 = vector.shape_cast %11 : vector<1x256x64xbf16> to vector<256x64xbf16>
    %c0_13 = arith.constant 0 : index
    %c0_14 = arith.constant 0 : index
    %c0_15 = arith.constant 0 : index
    %13 = vector.load %arg5[%c0_13, %c0_14, %c0_15] : memref<2x8x256xf32, #tpu.memory_space<vmem>>, vector<1x1x64xf32>
    %14 = vector.shape_cast %13 : vector<1x1x64xf32> to vector<1x64xf32>
    %c0_16 = arith.constant 0 : index
    %c1 = arith.constant 1 : index
    %c0_17 = arith.constant 0 : index
    %15 = vector.load %arg5[%c0_16, %c1, %c0_17] : memref<2x8x256xf32, #tpu.memory_space<vmem>>, vector<1x1x64xf32>
    %16 = vector.shape_cast %15 : vector<1x1x64xf32> to vector<1x64xf32>
    %c0_18 = arith.constant 0 : index
    %c2 = arith.constant 2 : index
    %c0_19 = arith.constant 0 : index
    %17 = vector.load %arg5[%c0_18, %c2, %c0_19] : memref<2x8x256xf32, #tpu.memory_space<vmem>>, vector<1x1x192xf32>
    %18 = vector.shape_cast %17 : vector<1x1x192xf32> to vector<1x192xf32>
    %c0_20 = arith.constant 0 : index
    %c3 = arith.constant 3 : index
    %c0_21 = arith.constant 0 : index
    %19 = vector.load %arg5[%c0_20, %c3, %c0_21] : memref<2x8x256xf32, #tpu.memory_space<vmem>>, vector<1x1x64xf32>
    %20 = vector.shape_cast %19 : vector<1x1x64xf32> to vector<1x64xf32>
    %c0_22 = arith.constant 0 : index
    %c4 = arith.constant 4 : index
    %c0_23 = arith.constant 0 : index
    %21 = vector.load %arg5[%c0_22, %c4, %c0_23] : memref<2x8x256xf32, #tpu.memory_space<vmem>>, vector<1x1x64xf32>
    %22 = vector.shape_cast %21 : vector<1x1x64xf32> to vector<1x64xf32>
    %c0_24 = arith.constant 0 : index
    %c5 = arith.constant 5 : index
    %c0_25 = arith.constant 0 : index
    %23 = vector.load %arg5[%c0_24, %c5, %c0_25] : memref<2x8x256xf32, #tpu.memory_space<vmem>>, vector<1x1x64xf32>
    %24 = vector.shape_cast %23 : vector<1x1x64xf32> to vector<1x64xf32>
    %c0_26 = arith.constant 0 : index
    %c6 = arith.constant 6 : index
    %c0_27 = arith.constant 0 : index
    %25 = vector.load %arg5[%c0_26, %c6, %c0_27] : memref<2x8x256xf32, #tpu.memory_space<vmem>>, vector<1x1x256xf32>
    %26 = vector.shape_cast %25 : vector<1x1x256xf32> to vector<1x256xf32>
    %c0_28 = arith.constant 0 : index
    %c7 = arith.constant 7 : index
    %c0_29 = arith.constant 0 : index
    %27 = vector.load %arg5[%c0_28, %c7, %c0_29] : memref<2x8x256xf32, #tpu.memory_space<vmem>>, vector<1x1x64xf32>
    %28 = vector.shape_cast %27 : vector<1x1x64xf32> to vector<1x64xf32>
    %cst_30 = arith.constant dense<0.000000e+00> : vector<10xf32>
    %29 = vector.multi_reduction <add>, %6, %cst_30 [1] : vector<10x64xf32> to vector<10xf32>
    %30 = vector.shape_cast %29 : vector<10xf32> to vector<10x1xf32>
    %cst_31 = arith.constant 6.400000e+01 : f32
    %31 = vector.broadcast %cst_31 : f32 to vector<10x1xf32>
    %32 = arith.divf %30, %31 : vector<10x1xf32>
    %33 = vector.broadcast %32 : vector<10x1xf32> to vector<10x64xf32>
    %34 = arith.subf %6, %33 : vector<10x64xf32>
    %35 = arith.mulf %34, %34 : vector<10x64xf32>
    %cst_32 = arith.constant dense<0.000000e+00> : vector<10xf32>
    %36 = vector.multi_reduction <add>, %35, %cst_32 [1] : vector<10x64xf32> to vector<10xf32>
    %37 = vector.shape_cast %36 : vector<10xf32> to vector<10x1xf32>
    %cst_33 = arith.constant 6.400000e+01 : f32
    %38 = vector.broadcast %cst_33 : f32 to vector<10x1xf32>
    %39 = arith.divf %37, %38 : vector<10x1xf32>
    %cst_34 = arith.constant 9.99999997E-7 : f32
    %40 = vector.broadcast %cst_34 : f32 to vector<10x1xf32>
    %41 = arith.addf %39, %40 : vector<10x1xf32>
    %42 = math.rsqrt %41 : vector<10x1xf32>
    %43 = vector.broadcast %42 : vector<10x1xf32> to vector<10x64xf32>
    %44 = arith.mulf %34, %43 : vector<10x64xf32>
    %45 = vector.broadcast %14 : vector<1x64xf32> to vector<10x64xf32>
    %46 = arith.mulf %44, %45 : vector<10x64xf32>
    %47 = vector.broadcast %16 : vector<1x64xf32> to vector<10x64xf32>
    %48 = arith.addf %46, %47 : vector<10x64xf32>
    %49 = arith.truncf %48 : vector<10x64xf32> to vector<10x64xbf16>
    %cst_35 = arith.constant dense<0.000000e+00> : vector<10x192xf32>
    %50 = tpu.matmul %49, %8, %cst_35 {dimension_numbers = #tpu.dot_dimension_numbers<[1], [0], [0], [1], [0, 0, 1, 1], [], []>} : vector<10x64xbf16>, vector<64x192xbf16>, vector<10x192xf32> -> vector<10x192xf32>
    %51 = vector.broadcast %18 : vector<1x192xf32> to vector<10x192xf32>
    %52 = arith.addf %50, %51 : vector<10x192xf32>
    %53 = vector.extract_strided_slice %52 {offsets = [0, 0], sizes = [10, 32], strides = [1, 1]} : vector<10x192xf32> to vector<10x32xf32>
    %54 = vector.extract_strided_slice %52 {offsets = [0, 64], sizes = [10, 32], strides = [1, 1]} : vector<10x192xf32> to vector<10x32xf32>
    %55 = vector.extract_strided_slice %52 {offsets = [0, 128], sizes = [10, 32], strides = [1, 1]} : vector<10x192xf32> to vector<10x32xf32>
    %cst_36 = arith.constant dense<0.000000e+00> : vector<10x10xf32>
    %56 = tpu.matmul %53, %54, %cst_36 {dimension_numbers = #tpu.dot_dimension_numbers<[1], [1], [0], [0], [0, 0, 1, 0], [], []>} : vector<10x32xf32>, vector<10x32xf32>, vector<10x10xf32> -> vector<10x10xf32>
    %57 = arith.addf %56, %2 : vector<10x10xf32>
    %cst_37 = arith.constant dense<0xFF800000> : vector<10xf32>
    %58 = vector.multi_reduction <maximumf>, %57, %cst_37 [1] : vector<10x10xf32> to vector<10xf32>
    %59 = vector.shape_cast %58 : vector<10xf32> to vector<10x1xf32>
    %60 = vector.broadcast %59 : vector<10x1xf32> to vector<10x10xf32>
    %61 = arith.subf %57, %60 : vector<10x10xf32>
    %62 = math.exp %61 : vector<10x10xf32>
    %cst_38 = arith.constant dense<0.000000e+00> : vector<10xf32>
    %63 = vector.multi_reduction <add>, %62, %cst_38 [1] : vector<10x10xf32> to vector<10xf32>
    %64 = vector.shape_cast %63 : vector<10xf32> to vector<10x1xf32>
    %65 = tpu.reciprocal %64 {approx = true} : vector<10x1xf32> -> vector<10x1xf32>
    %66 = vector.broadcast %65 : vector<10x1xf32> to vector<10x10xf32>
    %67 = arith.mulf %62, %66 : vector<10x10xf32>
    %cst_39 = arith.constant dense<0.000000e+00> : vector<10x32xf32>
    %68 = tpu.matmul %67, %55, %cst_39 {dimension_numbers = #tpu.dot_dimension_numbers<[1], [0], [0], [1], [0, 0, 1, 1], [], []>} : vector<10x10xf32>, vector<10x32xf32>, vector<10x32xf32> -> vector<10x32xf32>
    %c0_40 = arith.constant 0 : index
    %c0_41 = arith.constant 0 : index
    %c256 = arith.constant 256 : index
    %69 = vector.load %arg3[%c0_40, %c0_41, %c256] : memref<2x64x640xbf16, #tpu.memory_space<vmem>>, vector<1x32x64xbf16>
    %70 = vector.shape_cast %69 : vector<1x32x64xbf16> to vector<32x64xbf16>
    %71 = arith.truncf %68 : vector<10x32xf32> to vector<10x32xbf16>
    %cst_42 = arith.constant dense<0.000000e+00> : vector<10x64xf32>
    %72 = tpu.matmul %71, %70, %cst_42 {dimension_numbers = #tpu.dot_dimension_numbers<[1], [0], [0], [1], [0, 0, 1, 1], [], []>} : vector<10x32xbf16>, vector<32x64xbf16>, vector<10x64xf32> -> vector<10x64xf32>
    %73 = vector.extract_strided_slice %52 {offsets = [0, 32], sizes = [10, 32], strides = [1, 1]} : vector<10x192xf32> to vector<10x32xf32>
    %74 = vector.extract_strided_slice %52 {offsets = [0, 96], sizes = [10, 32], strides = [1, 1]} : vector<10x192xf32> to vector<10x32xf32>
    %75 = vector.extract_strided_slice %52 {offsets = [0, 160], sizes = [10, 32], strides = [1, 1]} : vector<10x192xf32> to vector<10x32xf32>
    %cst_43 = arith.constant dense<0.000000e+00> : vector<10x10xf32>
    %76 = tpu.matmul %73, %74, %cst_43 {dimension_numbers = #tpu.dot_dimension_numbers<[1], [1], [0], [0], [0, 0, 1, 0], [], []>} : vector<10x32xf32>, vector<10x32xf32>, vector<10x10xf32> -> vector<10x10xf32>
    %77 = arith.addf %76, %2 : vector<10x10xf32>
    %cst_44 = arith.constant dense<0xFF800000> : vector<10xf32>
    %78 = vector.multi_reduction <maximumf>, %77, %cst_44 [1] : vector<10x10xf32> to vector<10xf32>
    %79 = vector.shape_cast %78 : vector<10xf32> to vector<10x1xf32>
    %80 = vector.broadcast %79 : vector<10x1xf32> to vector<10x10xf32>
    %81 = arith.subf %77, %80 : vector<10x10xf32>
    %82 = math.exp %81 : vector<10x10xf32>
    %cst_45 = arith.constant dense<0.000000e+00> : vector<10xf32>
    %83 = vector.multi_reduction <add>, %82, %cst_45 [1] : vector<10x10xf32> to vector<10xf32>
    %84 = vector.shape_cast %83 : vector<10xf32> to vector<10x1xf32>
    %85 = tpu.reciprocal %84 {approx = true} : vector<10x1xf32> -> vector<10x1xf32>
    %86 = vector.broadcast %85 : vector<10x1xf32> to vector<10x10xf32>
    %87 = arith.mulf %82, %86 : vector<10x10xf32>
    %cst_46 = arith.constant dense<0.000000e+00> : vector<10x32xf32>
    %88 = tpu.matmul %87, %75, %cst_46 {dimension_numbers = #tpu.dot_dimension_numbers<[1], [0], [0], [1], [0, 0, 1, 1], [], []>} : vector<10x10xf32>, vector<10x32xf32>, vector<10x32xf32> -> vector<10x32xf32>
    %c0_47 = arith.constant 0 : index
    %c32 = arith.constant 32 : index
    %c256_48 = arith.constant 256 : index
    %89 = vector.load %arg3[%c0_47, %c32, %c256_48] : memref<2x64x640xbf16, #tpu.memory_space<vmem>>, vector<1x32x64xbf16>
    %90 = vector.shape_cast %89 : vector<1x32x64xbf16> to vector<32x64xbf16>
    %91 = arith.truncf %88 : vector<10x32xf32> to vector<10x32xbf16>
    %cst_49 = arith.constant dense<0.000000e+00> : vector<10x64xf32>
    %92 = tpu.matmul %91, %90, %cst_49 {dimension_numbers = #tpu.dot_dimension_numbers<[1], [0], [0], [1], [0, 0, 1, 1], [], []>} : vector<10x32xbf16>, vector<32x64xbf16>, vector<10x64xf32> -> vector<10x64xf32>
    %93 = arith.addf %72, %92 : vector<10x64xf32>
    %94 = arith.addf %6, %93 : vector<10x64xf32>
    %95 = vector.broadcast %20 : vector<1x64xf32> to vector<10x64xf32>
    %96 = arith.addf %94, %95 : vector<10x64xf32>
    %cst_50 = arith.constant dense<0.000000e+00> : vector<10xf32>
    %97 = vector.multi_reduction <add>, %96, %cst_50 [1] : vector<10x64xf32> to vector<10xf32>
    %98 = vector.shape_cast %97 : vector<10xf32> to vector<10x1xf32>
    %cst_51 = arith.constant 6.400000e+01 : f32
    %99 = vector.broadcast %cst_51 : f32 to vector<10x1xf32>
    %100 = arith.divf %98, %99 : vector<10x1xf32>
    %101 = vector.broadcast %100 : vector<10x1xf32> to vector<10x64xf32>
    %102 = arith.subf %96, %101 : vector<10x64xf32>
    %103 = arith.mulf %102, %102 : vector<10x64xf32>
    %cst_52 = arith.constant dense<0.000000e+00> : vector<10xf32>
    %104 = vector.multi_reduction <add>, %103, %cst_52 [1] : vector<10x64xf32> to vector<10xf32>
    %105 = vector.shape_cast %104 : vector<10xf32> to vector<10x1xf32>
    %cst_53 = arith.constant 6.400000e+01 : f32
    %106 = vector.broadcast %cst_53 : f32 to vector<10x1xf32>
    %107 = arith.divf %105, %106 : vector<10x1xf32>
    %cst_54 = arith.constant 9.99999997E-7 : f32
    %108 = vector.broadcast %cst_54 : f32 to vector<10x1xf32>
    %109 = arith.addf %107, %108 : vector<10x1xf32>
    %110 = math.rsqrt %109 : vector<10x1xf32>
    %111 = vector.broadcast %110 : vector<10x1xf32> to vector<10x64xf32>
    %112 = arith.mulf %102, %111 : vector<10x64xf32>
    %113 = vector.broadcast %22 : vector<1x64xf32> to vector<10x64xf32>
    %114 = arith.mulf %112, %113 : vector<10x64xf32>
    %115 = vector.broadcast %24 : vector<1x64xf32> to vector<10x64xf32>
    %116 = arith.addf %114, %115 : vector<10x64xf32>
    %117 = arith.truncf %116 : vector<10x64xf32> to vector<10x64xbf16>
    %cst_55 = arith.constant dense<0.000000e+00> : vector<10x256xf32>
    %118 = tpu.matmul %117, %10, %cst_55 {dimension_numbers = #tpu.dot_dimension_numbers<[1], [0], [0], [1], [0, 0, 1, 1], [], []>} : vector<10x64xbf16>, vector<64x256xbf16>, vector<10x256xf32> -> vector<10x256xf32>
    %119 = vector.broadcast %26 : vector<1x256xf32> to vector<10x256xf32>
    %120 = arith.addf %118, %119 : vector<10x256xf32>
    %cst_56 = arith.constant 5.000000e-01 : f32
    %121 = vector.broadcast %cst_56 : f32 to vector<10x256xf32>
    %122 = arith.mulf %121, %120 : vector<10x256xf32>
    %cst_57 = arith.constant 0.707106769 : f32
    %123 = vector.broadcast %cst_57 : f32 to vector<10x256xf32>
    %124 = arith.mulf %120, %123 : vector<10x256xf32>
    %cst_58 = arith.constant 0.000000e+00 : f32
    %125 = vector.broadcast %cst_58 : f32 to vector<10x256xf32>
    %126 = arith.cmpf oge, %124, %125 : vector<10x256xf32>
    %cst_59 = arith.constant 1.000000e+00 : f32
    %cst_60 = arith.constant -1.000000e+00 : f32
    %127 = vector.broadcast %cst_59 : f32 to vector<10x256xf32>
    %128 = vector.broadcast %cst_60 : f32 to vector<10x256xf32>
    %129 = arith.select %126, %127, %128 : vector<10x256xi1>, vector<10x256xf32>
    %130 = math.absf %124 : vector<10x256xf32>
    %cst_61 = arith.constant 0.327591091 : f32
    %131 = vector.broadcast %cst_61 : f32 to vector<10x256xf32>
    %132 = arith.mulf %131, %130 : vector<10x256xf32>
    %cst_62 = arith.constant 1.000000e+00 : f32
    %133 = vector.broadcast %cst_62 : f32 to vector<10x256xf32>
    %134 = arith.addf %133, %132 : vector<10x256xf32>
    %cst_63 = arith.constant 1.000000e+00 : f32
    %135 = vector.broadcast %cst_63 : f32 to vector<10x256xf32>
    %136 = arith.divf %135, %134 : vector<10x256xf32>
    %cst_64 = arith.constant 1.06140542 : f32
    %137 = vector.broadcast %cst_64 : f32 to vector<10x256xf32>
    %138 = arith.mulf %137, %136 : vector<10x256xf32>
    %cst_65 = arith.constant -1.45315206 : f32
    %139 = vector.broadcast %cst_65 : f32 to vector<10x256xf32>
    %140 = arith.addf %138, %139 : vector<10x256xf32>
    %141 = arith.mulf %140, %136 : vector<10x256xf32>
    %cst_66 = arith.constant 1.42141378 : f32
    %142 = vector.broadcast %cst_66 : f32 to vector<10x256xf32>
    %143 = arith.addf %141, %142 : vector<10x256xf32>
    %144 = arith.mulf %143, %136 : vector<10x256xf32>
    %cst_67 = arith.constant -0.284496725 : f32
    %145 = vector.broadcast %cst_67 : f32 to vector<10x256xf32>
    %146 = arith.addf %144, %145 : vector<10x256xf32>
    %147 = arith.mulf %146, %136 : vector<10x256xf32>
    %cst_68 = arith.constant 0.254829586 : f32
    %148 = vector.broadcast %cst_68 : f32 to vector<10x256xf32>
    %149 = arith.addf %147, %148 : vector<10x256xf32>
    %150 = arith.mulf %149, %136 : vector<10x256xf32>
    %cst_69 = arith.constant 0.000000e+00 : f32
    %151 = vector.broadcast %cst_69 : f32 to vector<10x256xf32>
    %152 = arith.subf %151, %130 : vector<10x256xf32>
    %153 = arith.mulf %152, %130 : vector<10x256xf32>
    %154 = math.exp %153 : vector<10x256xf32>
    %155 = arith.mulf %150, %154 : vector<10x256xf32>
    %cst_70 = arith.constant 1.000000e+00 : f32
    %156 = vector.broadcast %cst_70 : f32 to vector<10x256xf32>
    %157 = arith.subf %156, %155 : vector<10x256xf32>
    %158 = arith.mulf %129, %157 : vector<10x256xf32>
    %cst_71 = arith.constant 1.000000e+00 : f32
    %159 = vector.broadcast %cst_71 : f32 to vector<10x256xf32>
    %160 = arith.addf %159, %158 : vector<10x256xf32>
    %161 = arith.mulf %122, %160 : vector<10x256xf32>
    %162 = arith.truncf %161 : vector<10x256xf32> to vector<10x256xbf16>
    %cst_72 = arith.constant dense<0.000000e+00> : vector<10x64xf32>
    %163 = tpu.matmul %162, %12, %cst_72 {dimension_numbers = #tpu.dot_dimension_numbers<[1], [0], [0], [1], [0, 0, 1, 1], [], []>} : vector<10x256xbf16>, vector<256x64xbf16>, vector<10x64xf32> -> vector<10x64xf32>
    %164 = arith.addf %96, %163 : vector<10x64xf32>
    %165 = vector.broadcast %28 : vector<1x64xf32> to vector<10x64xf32>
    %166 = arith.addf %164, %165 : vector<10x64xf32>
    %c1_73 = arith.constant 1 : index
    %c0_74 = arith.constant 0 : index
    %c0_75 = arith.constant 0 : index
    %167 = vector.load %arg3[%c1_73, %c0_74, %c0_75] : memref<2x64x640xbf16, #tpu.memory_space<vmem>>, vector<1x64x192xbf16>
    %168 = vector.shape_cast %167 : vector<1x64x192xbf16> to vector<64x192xbf16>
    %c1_76 = arith.constant 1 : index
    %c0_77 = arith.constant 0 : index
    %c384_78 = arith.constant 384 : index
    %169 = vector.load %arg3[%c1_76, %c0_77, %c384_78] : memref<2x64x640xbf16, #tpu.memory_space<vmem>>, vector<1x64x256xbf16>
    %170 = vector.shape_cast %169 : vector<1x64x256xbf16> to vector<64x256xbf16>
    %c1_79 = arith.constant 1 : index
    %c0_80 = arith.constant 0 : index
    %c0_81 = arith.constant 0 : index
    %171 = vector.load %arg4[%c1_79, %c0_80, %c0_81] : memref<2x256x64xbf16, #tpu.memory_space<vmem>>, vector<1x256x64xbf16>
    %172 = vector.shape_cast %171 : vector<1x256x64xbf16> to vector<256x64xbf16>
    %c1_82 = arith.constant 1 : index
    %c0_83 = arith.constant 0 : index
    %c0_84 = arith.constant 0 : index
    %173 = vector.load %arg5[%c1_82, %c0_83, %c0_84] : memref<2x8x256xf32, #tpu.memory_space<vmem>>, vector<1x1x64xf32>
    %174 = vector.shape_cast %173 : vector<1x1x64xf32> to vector<1x64xf32>
    %c1_85 = arith.constant 1 : index
    %c1_86 = arith.constant 1 : index
    %c0_87 = arith.constant 0 : index
    %175 = vector.load %arg5[%c1_85, %c1_86, %c0_87] : memref<2x8x256xf32, #tpu.memory_space<vmem>>, vector<1x1x64xf32>
    %176 = vector.shape_cast %175 : vector<1x1x64xf32> to vector<1x64xf32>
    %c1_88 = arith.constant 1 : index
    %c2_89 = arith.constant 2 : index
    %c0_90 = arith.constant 0 : index
    %177 = vector.load %arg5[%c1_88, %c2_89, %c0_90] : memref<2x8x256xf32, #tpu.memory_space<vmem>>, vector<1x1x192xf32>
    %178 = vector.shape_cast %177 : vector<1x1x192xf32> to vector<1x192xf32>
    %c1_91 = arith.constant 1 : index
    %c3_92 = arith.constant 3 : index
    %c0_93 = arith.constant 0 : index
    %179 = vector.load %arg5[%c1_91, %c3_92, %c0_93] : memref<2x8x256xf32, #tpu.memory_space<vmem>>, vector<1x1x64xf32>
    %180 = vector.shape_cast %179 : vector<1x1x64xf32> to vector<1x64xf32>
    %c1_94 = arith.constant 1 : index
    %c4_95 = arith.constant 4 : index
    %c0_96 = arith.constant 0 : index
    %181 = vector.load %arg5[%c1_94, %c4_95, %c0_96] : memref<2x8x256xf32, #tpu.memory_space<vmem>>, vector<1x1x64xf32>
    %182 = vector.shape_cast %181 : vector<1x1x64xf32> to vector<1x64xf32>
    %c1_97 = arith.constant 1 : index
    %c5_98 = arith.constant 5 : index
    %c0_99 = arith.constant 0 : index
    %183 = vector.load %arg5[%c1_97, %c5_98, %c0_99] : memref<2x8x256xf32, #tpu.memory_space<vmem>>, vector<1x1x64xf32>
    %184 = vector.shape_cast %183 : vector<1x1x64xf32> to vector<1x64xf32>
    %c1_100 = arith.constant 1 : index
    %c6_101 = arith.constant 6 : index
    %c0_102 = arith.constant 0 : index
    %185 = vector.load %arg5[%c1_100, %c6_101, %c0_102] : memref<2x8x256xf32, #tpu.memory_space<vmem>>, vector<1x1x256xf32>
    %186 = vector.shape_cast %185 : vector<1x1x256xf32> to vector<1x256xf32>
    %c1_103 = arith.constant 1 : index
    %c7_104 = arith.constant 7 : index
    %c0_105 = arith.constant 0 : index
    %187 = vector.load %arg5[%c1_103, %c7_104, %c0_105] : memref<2x8x256xf32, #tpu.memory_space<vmem>>, vector<1x1x64xf32>
    %188 = vector.shape_cast %187 : vector<1x1x64xf32> to vector<1x64xf32>
    %cst_106 = arith.constant dense<0.000000e+00> : vector<10xf32>
    %189 = vector.multi_reduction <add>, %166, %cst_106 [1] : vector<10x64xf32> to vector<10xf32>
    %190 = vector.shape_cast %189 : vector<10xf32> to vector<10x1xf32>
    %cst_107 = arith.constant 6.400000e+01 : f32
    %191 = vector.broadcast %cst_107 : f32 to vector<10x1xf32>
    %192 = arith.divf %190, %191 : vector<10x1xf32>
    %193 = vector.broadcast %192 : vector<10x1xf32> to vector<10x64xf32>
    %194 = arith.subf %166, %193 : vector<10x64xf32>
    %195 = arith.mulf %194, %194 : vector<10x64xf32>
    %cst_108 = arith.constant dense<0.000000e+00> : vector<10xf32>
    %196 = vector.multi_reduction <add>, %195, %cst_108 [1] : vector<10x64xf32> to vector<10xf32>
    %197 = vector.shape_cast %196 : vector<10xf32> to vector<10x1xf32>
    %cst_109 = arith.constant 6.400000e+01 : f32
    %198 = vector.broadcast %cst_109 : f32 to vector<10x1xf32>
    %199 = arith.divf %197, %198 : vector<10x1xf32>
    %cst_110 = arith.constant 9.99999997E-7 : f32
    %200 = vector.broadcast %cst_110 : f32 to vector<10x1xf32>
    %201 = arith.addf %199, %200 : vector<10x1xf32>
    %202 = math.rsqrt %201 : vector<10x1xf32>
    %203 = vector.broadcast %202 : vector<10x1xf32> to vector<10x64xf32>
    %204 = arith.mulf %194, %203 : vector<10x64xf32>
    %205 = vector.broadcast %174 : vector<1x64xf32> to vector<10x64xf32>
    %206 = arith.mulf %204, %205 : vector<10x64xf32>
    %207 = vector.broadcast %176 : vector<1x64xf32> to vector<10x64xf32>
    %208 = arith.addf %206, %207 : vector<10x64xf32>
    %209 = arith.truncf %208 : vector<10x64xf32> to vector<10x64xbf16>
    %cst_111 = arith.constant dense<0.000000e+00> : vector<10x192xf32>
    %210 = tpu.matmul %209, %168, %cst_111 {dimension_numbers = #tpu.dot_dimension_numbers<[1], [0], [0], [1], [0, 0, 1, 1], [], []>} : vector<10x64xbf16>, vector<64x192xbf16>, vector<10x192xf32> -> vector<10x192xf32>
    %211 = vector.broadcast %178 : vector<1x192xf32> to vector<10x192xf32>
    %212 = arith.addf %210, %211 : vector<10x192xf32>
    %213 = vector.extract_strided_slice %212 {offsets = [0, 0], sizes = [10, 32], strides = [1, 1]} : vector<10x192xf32> to vector<10x32xf32>
    %214 = vector.extract_strided_slice %212 {offsets = [0, 64], sizes = [10, 32], strides = [1, 1]} : vector<10x192xf32> to vector<10x32xf32>
    %215 = vector.extract_strided_slice %212 {offsets = [0, 128], sizes = [10, 32], strides = [1, 1]} : vector<10x192xf32> to vector<10x32xf32>
    %cst_112 = arith.constant dense<0.000000e+00> : vector<10x10xf32>
    %216 = tpu.matmul %213, %214, %cst_112 {dimension_numbers = #tpu.dot_dimension_numbers<[1], [1], [0], [0], [0, 0, 1, 0], [], []>} : vector<10x32xf32>, vector<10x32xf32>, vector<10x10xf32> -> vector<10x10xf32>
    %217 = arith.addf %216, %2 : vector<10x10xf32>
    %cst_113 = arith.constant dense<0xFF800000> : vector<10xf32>
    %218 = vector.multi_reduction <maximumf>, %217, %cst_113 [1] : vector<10x10xf32> to vector<10xf32>
    %219 = vector.shape_cast %218 : vector<10xf32> to vector<10x1xf32>
    %220 = vector.broadcast %219 : vector<10x1xf32> to vector<10x10xf32>
    %221 = arith.subf %217, %220 : vector<10x10xf32>
    %222 = math.exp %221 : vector<10x10xf32>
    %cst_114 = arith.constant dense<0.000000e+00> : vector<10xf32>
    %223 = vector.multi_reduction <add>, %222, %cst_114 [1] : vector<10x10xf32> to vector<10xf32>
    %224 = vector.shape_cast %223 : vector<10xf32> to vector<10x1xf32>
    %225 = tpu.reciprocal %224 {approx = true} : vector<10x1xf32> -> vector<10x1xf32>
    %226 = vector.broadcast %225 : vector<10x1xf32> to vector<10x10xf32>
    %227 = arith.mulf %222, %226 : vector<10x10xf32>
    %cst_115 = arith.constant dense<0.000000e+00> : vector<10x32xf32>
    %228 = tpu.matmul %227, %215, %cst_115 {dimension_numbers = #tpu.dot_dimension_numbers<[1], [0], [0], [1], [0, 0, 1, 1], [], []>} : vector<10x10xf32>, vector<10x32xf32>, vector<10x32xf32> -> vector<10x32xf32>
    %c1_116 = arith.constant 1 : index
    %c0_117 = arith.constant 0 : index
    %c256_118 = arith.constant 256 : index
    %229 = vector.load %arg3[%c1_116, %c0_117, %c256_118] : memref<2x64x640xbf16, #tpu.memory_space<vmem>>, vector<1x32x64xbf16>
    %230 = vector.shape_cast %229 : vector<1x32x64xbf16> to vector<32x64xbf16>
    %231 = arith.truncf %228 : vector<10x32xf32> to vector<10x32xbf16>
    %cst_119 = arith.constant dense<0.000000e+00> : vector<10x64xf32>
    %232 = tpu.matmul %231, %230, %cst_119 {dimension_numbers = #tpu.dot_dimension_numbers<[1], [0], [0], [1], [0, 0, 1, 1], [], []>} : vector<10x32xbf16>, vector<32x64xbf16>, vector<10x64xf32> -> vector<10x64xf32>
    %233 = vector.extract_strided_slice %212 {offsets = [0, 32], sizes = [10, 32], strides = [1, 1]} : vector<10x192xf32> to vector<10x32xf32>
    %234 = vector.extract_strided_slice %212 {offsets = [0, 96], sizes = [10, 32], strides = [1, 1]} : vector<10x192xf32> to vector<10x32xf32>
    %235 = vector.extract_strided_slice %212 {offsets = [0, 160], sizes = [10, 32], strides = [1, 1]} : vector<10x192xf32> to vector<10x32xf32>
    %cst_120 = arith.constant dense<0.000000e+00> : vector<10x10xf32>
    %236 = tpu.matmul %233, %234, %cst_120 {dimension_numbers = #tpu.dot_dimension_numbers<[1], [1], [0], [0], [0, 0, 1, 0], [], []>} : vector<10x32xf32>, vector<10x32xf32>, vector<10x10xf32> -> vector<10x10xf32>
    %237 = arith.addf %236, %2 : vector<10x10xf32>
    %cst_121 = arith.constant dense<0xFF800000> : vector<10xf32>
    %238 = vector.multi_reduction <maximumf>, %237, %cst_121 [1] : vector<10x10xf32> to vector<10xf32>
    %239 = vector.shape_cast %238 : vector<10xf32> to vector<10x1xf32>
    %240 = vector.broadcast %239 : vector<10x1xf32> to vector<10x10xf32>
    %241 = arith.subf %237, %240 : vector<10x10xf32>
    %242 = math.exp %241 : vector<10x10xf32>
    %cst_122 = arith.constant dense<0.000000e+00> : vector<10xf32>
    %243 = vector.multi_reduction <add>, %242, %cst_122 [1] : vector<10x10xf32> to vector<10xf32>
    %244 = vector.shape_cast %243 : vector<10xf32> to vector<10x1xf32>
    %245 = tpu.reciprocal %244 {approx = true} : vector<10x1xf32> -> vector<10x1xf32>
    %246 = vector.broadcast %245 : vector<10x1xf32> to vector<10x10xf32>
    %247 = arith.mulf %242, %246 : vector<10x10xf32>
    %cst_123 = arith.constant dense<0.000000e+00> : vector<10x32xf32>
    %248 = tpu.matmul %247, %235, %cst_123 {dimension_numbers = #tpu.dot_dimension_numbers<[1], [0], [0], [1], [0, 0, 1, 1], [], []>} : vector<10x10xf32>, vector<10x32xf32>, vector<10x32xf32> -> vector<10x32xf32>
    %c1_124 = arith.constant 1 : index
    %c32_125 = arith.constant 32 : index
    %c256_126 = arith.constant 256 : index
    %249 = vector.load %arg3[%c1_124, %c32_125, %c256_126] : memref<2x64x640xbf16, #tpu.memory_space<vmem>>, vector<1x32x64xbf16>
    %250 = vector.shape_cast %249 : vector<1x32x64xbf16> to vector<32x64xbf16>
    %251 = arith.truncf %248 : vector<10x32xf32> to vector<10x32xbf16>
    %cst_127 = arith.constant dense<0.000000e+00> : vector<10x64xf32>
    %252 = tpu.matmul %251, %250, %cst_127 {dimension_numbers = #tpu.dot_dimension_numbers<[1], [0], [0], [1], [0, 0, 1, 1], [], []>} : vector<10x32xbf16>, vector<32x64xbf16>, vector<10x64xf32> -> vector<10x64xf32>
    %253 = arith.addf %232, %252 : vector<10x64xf32>
    %254 = arith.addf %166, %253 : vector<10x64xf32>
    %255 = vector.broadcast %180 : vector<1x64xf32> to vector<10x64xf32>
    %256 = arith.addf %254, %255 : vector<10x64xf32>
    %cst_128 = arith.constant dense<0.000000e+00> : vector<10xf32>
    %257 = vector.multi_reduction <add>, %256, %cst_128 [1] : vector<10x64xf32> to vector<10xf32>
    %258 = vector.shape_cast %257 : vector<10xf32> to vector<10x1xf32>
    %cst_129 = arith.constant 6.400000e+01 : f32
    %259 = vector.broadcast %cst_129 : f32 to vector<10x1xf32>
    %260 = arith.divf %258, %259 : vector<10x1xf32>
    %261 = vector.broadcast %260 : vector<10x1xf32> to vector<10x64xf32>
    %262 = arith.subf %256, %261 : vector<10x64xf32>
    %263 = arith.mulf %262, %262 : vector<10x64xf32>
    %cst_130 = arith.constant dense<0.000000e+00> : vector<10xf32>
    %264 = vector.multi_reduction <add>, %263, %cst_130 [1] : vector<10x64xf32> to vector<10xf32>
    %265 = vector.shape_cast %264 : vector<10xf32> to vector<10x1xf32>
    %cst_131 = arith.constant 6.400000e+01 : f32
    %266 = vector.broadcast %cst_131 : f32 to vector<10x1xf32>
    %267 = arith.divf %265, %266 : vector<10x1xf32>
    %cst_132 = arith.constant 9.99999997E-7 : f32
    %268 = vector.broadcast %cst_132 : f32 to vector<10x1xf32>
    %269 = arith.addf %267, %268 : vector<10x1xf32>
    %270 = math.rsqrt %269 : vector<10x1xf32>
    %271 = vector.broadcast %270 : vector<10x1xf32> to vector<10x64xf32>
    %272 = arith.mulf %262, %271 : vector<10x64xf32>
    %273 = vector.broadcast %182 : vector<1x64xf32> to vector<10x64xf32>
    %274 = arith.mulf %272, %273 : vector<10x64xf32>
    %275 = vector.broadcast %184 : vector<1x64xf32> to vector<10x64xf32>
    %276 = arith.addf %274, %275 : vector<10x64xf32>
    %277 = arith.truncf %276 : vector<10x64xf32> to vector<10x64xbf16>
    %cst_133 = arith.constant dense<0.000000e+00> : vector<10x256xf32>
    %278 = tpu.matmul %277, %170, %cst_133 {dimension_numbers = #tpu.dot_dimension_numbers<[1], [0], [0], [1], [0, 0, 1, 1], [], []>} : vector<10x64xbf16>, vector<64x256xbf16>, vector<10x256xf32> -> vector<10x256xf32>
    %279 = vector.broadcast %186 : vector<1x256xf32> to vector<10x256xf32>
    %280 = arith.addf %278, %279 : vector<10x256xf32>
    %cst_134 = arith.constant 5.000000e-01 : f32
    %281 = vector.broadcast %cst_134 : f32 to vector<10x256xf32>
    %282 = arith.mulf %281, %280 : vector<10x256xf32>
    %cst_135 = arith.constant 0.707106769 : f32
    %283 = vector.broadcast %cst_135 : f32 to vector<10x256xf32>
    %284 = arith.mulf %280, %283 : vector<10x256xf32>
    %cst_136 = arith.constant 0.000000e+00 : f32
    %285 = vector.broadcast %cst_136 : f32 to vector<10x256xf32>
    %286 = arith.cmpf oge, %284, %285 : vector<10x256xf32>
    %cst_137 = arith.constant 1.000000e+00 : f32
    %cst_138 = arith.constant -1.000000e+00 : f32
    %287 = vector.broadcast %cst_137 : f32 to vector<10x256xf32>
    %288 = vector.broadcast %cst_138 : f32 to vector<10x256xf32>
    %289 = arith.select %286, %287, %288 : vector<10x256xi1>, vector<10x256xf32>
    %290 = math.absf %284 : vector<10x256xf32>
    %cst_139 = arith.constant 0.327591091 : f32
    %291 = vector.broadcast %cst_139 : f32 to vector<10x256xf32>
    %292 = arith.mulf %291, %290 : vector<10x256xf32>
    %cst_140 = arith.constant 1.000000e+00 : f32
    %293 = vector.broadcast %cst_140 : f32 to vector<10x256xf32>
    %294 = arith.addf %293, %292 : vector<10x256xf32>
    %cst_141 = arith.constant 1.000000e+00 : f32
    %295 = vector.broadcast %cst_141 : f32 to vector<10x256xf32>
    %296 = arith.divf %295, %294 : vector<10x256xf32>
    %cst_142 = arith.constant 1.06140542 : f32
    %297 = vector.broadcast %cst_142 : f32 to vector<10x256xf32>
    %298 = arith.mulf %297, %296 : vector<10x256xf32>
    %cst_143 = arith.constant -1.45315206 : f32
    %299 = vector.broadcast %cst_143 : f32 to vector<10x256xf32>
    %300 = arith.addf %298, %299 : vector<10x256xf32>
    %301 = arith.mulf %300, %296 : vector<10x256xf32>
    %cst_144 = arith.constant 1.42141378 : f32
    %302 = vector.broadcast %cst_144 : f32 to vector<10x256xf32>
    %303 = arith.addf %301, %302 : vector<10x256xf32>
    %304 = arith.mulf %303, %296 : vector<10x256xf32>
    %cst_145 = arith.constant -0.284496725 : f32
    %305 = vector.broadcast %cst_145 : f32 to vector<10x256xf32>
    %306 = arith.addf %304, %305 : vector<10x256xf32>
    %307 = arith.mulf %306, %296 : vector<10x256xf32>
    %cst_146 = arith.constant 0.254829586 : f32
    %308 = vector.broadcast %cst_146 : f32 to vector<10x256xf32>
    %309 = arith.addf %307, %308 : vector<10x256xf32>
    %310 = arith.mulf %309, %296 : vector<10x256xf32>
    %cst_147 = arith.constant 0.000000e+00 : f32
    %311 = vector.broadcast %cst_147 : f32 to vector<10x256xf32>
    %312 = arith.subf %311, %290 : vector<10x256xf32>
    %313 = arith.mulf %312, %290 : vector<10x256xf32>
    %314 = math.exp %313 : vector<10x256xf32>
    %315 = arith.mulf %310, %314 : vector<10x256xf32>
    %cst_148 = arith.constant 1.000000e+00 : f32
    %316 = vector.broadcast %cst_148 : f32 to vector<10x256xf32>
    %317 = arith.subf %316, %315 : vector<10x256xf32>
    %318 = arith.mulf %289, %317 : vector<10x256xf32>
    %cst_149 = arith.constant 1.000000e+00 : f32
    %319 = vector.broadcast %cst_149 : f32 to vector<10x256xf32>
    %320 = arith.addf %319, %318 : vector<10x256xf32>
    %321 = arith.mulf %282, %320 : vector<10x256xf32>
    %322 = arith.truncf %321 : vector<10x256xf32> to vector<10x256xbf16>
    %cst_150 = arith.constant dense<0.000000e+00> : vector<10x64xf32>
    %323 = tpu.matmul %322, %172, %cst_150 {dimension_numbers = #tpu.dot_dimension_numbers<[1], [0], [0], [1], [0, 0, 1, 1], [], []>} : vector<10x256xbf16>, vector<256x64xbf16>, vector<10x64xf32> -> vector<10x64xf32>
    %324 = arith.addf %256, %323 : vector<10x64xf32>
    %325 = vector.broadcast %188 : vector<1x64xf32> to vector<10x64xf32>
    %326 = arith.addf %324, %325 : vector<10x64xf32>
    %c0_151 = arith.constant 0 : index
    %c0_152 = arith.constant 0 : index
    %327 = vector.load %arg7[%c0_151, %c0_152] : memref<8x128xf32, #tpu.memory_space<vmem>>, vector<1x64xf32>
    %c1_153 = arith.constant 1 : index
    %c0_154 = arith.constant 0 : index
    %328 = vector.load %arg7[%c1_153, %c0_154] : memref<8x128xf32, #tpu.memory_space<vmem>>, vector<1x64xf32>
    %c2_155 = arith.constant 2 : index
    %c0_156 = arith.constant 0 : index
    %329 = vector.load %arg7[%c2_155, %c0_156] : memref<8x128xf32, #tpu.memory_space<vmem>>, vector<1x128xf32>
    %330 = vector.extract_strided_slice %326 {offsets = [0, 0], sizes = [2, 64], strides = [1, 1]} : vector<10x64xf32> to vector<2x64xf32>
    %cst_157 = arith.constant dense<0.000000e+00> : vector<2xf32>
    %331 = vector.multi_reduction <add>, %330, %cst_157 [1] : vector<2x64xf32> to vector<2xf32>
    %332 = vector.shape_cast %331 : vector<2xf32> to vector<2x1xf32>
    %cst_158 = arith.constant 6.400000e+01 : f32
    %333 = vector.broadcast %cst_158 : f32 to vector<2x1xf32>
    %334 = arith.divf %332, %333 : vector<2x1xf32>
    %335 = vector.broadcast %334 : vector<2x1xf32> to vector<2x64xf32>
    %336 = arith.subf %330, %335 : vector<2x64xf32>
    %337 = arith.mulf %336, %336 : vector<2x64xf32>
    %cst_159 = arith.constant dense<0.000000e+00> : vector<2xf32>
    %338 = vector.multi_reduction <add>, %337, %cst_159 [1] : vector<2x64xf32> to vector<2xf32>
    %339 = vector.shape_cast %338 : vector<2xf32> to vector<2x1xf32>
    %cst_160 = arith.constant 6.400000e+01 : f32
    %340 = vector.broadcast %cst_160 : f32 to vector<2x1xf32>
    %341 = arith.divf %339, %340 : vector<2x1xf32>
    %cst_161 = arith.constant 9.99999997E-7 : f32
    %342 = vector.broadcast %cst_161 : f32 to vector<2x1xf32>
    %343 = arith.addf %341, %342 : vector<2x1xf32>
    %344 = math.rsqrt %343 : vector<2x1xf32>
    %345 = vector.broadcast %344 : vector<2x1xf32> to vector<2x64xf32>
    %346 = arith.mulf %336, %345 : vector<2x64xf32>
    %347 = vector.broadcast %327 : vector<1x64xf32> to vector<2x64xf32>
    %348 = arith.mulf %346, %347 : vector<2x64xf32>
    %349 = vector.broadcast %328 : vector<1x64xf32> to vector<2x64xf32>
    %350 = arith.addf %348, %349 : vector<2x64xf32>
    %351 = arith.truncf %350 : vector<2x64xf32> to vector<2x64xbf16>
    %c0_162 = arith.constant 0 : index
    %c0_163 = arith.constant 0 : index
    %352 = vector.load %arg6[%c0_162, %c0_163] : memref<64x128xbf16, #tpu.memory_space<vmem>>, vector<64x128xbf16>
    %cst_164 = arith.constant dense<0.000000e+00> : vector<2x128xf32>
    %353 = tpu.matmul %351, %352, %cst_164 {dimension_numbers = #tpu.dot_dimension_numbers<[1], [0], [0], [1], [0, 0, 1, 1], [], []>} : vector<2x64xbf16>, vector<64x128xbf16>, vector<2x128xf32> -> vector<2x128xf32>
    %354 = vector.broadcast %329 : vector<1x128xf32> to vector<2x128xf32>
    %355 = arith.addf %353, %354 : vector<2x128xf32>
    %c0_165 = arith.constant 0 : index
    %c0_166 = arith.constant 0 : index
    %356 = vector.load %arg8[%c0_165, %c0_166] : memref<2x128xf32, #tpu.memory_space<vmem>>, vector<2x128xf32>
    tpu.vector_store %arg8[%c0_165, %c0_166], %355 {strides = array<i32>} : memref<2x128xf32, #tpu.memory_space<vmem>>, vector<2x128xf32>,
    return
  }
}

</mosaic_0001>

<bundles_post_ra>
// kernel: _vit_forward.1
= control target key start
LH: loop header
LB: loop body
LE: loop exit
PB: predicated region body
PF: predicated region fallthrough
CT: control target
= control target key end

     0   :  { %v3188_v1 = vmov 0   ;;  %vm140_vm0 = vcmask 523264   ;;  %s3892_s0 = inlined_call_operand.vmem [shape: bf16[10,192], index: 0, kind: input, shape index: {}]   ;;  %s3893_s1 = inlined_call_operand.vmem [shape: bf16[192,64], index: 1, kind: input, shape index: {}]   ;;  %s3894_s2 = inlined_call_operand.vmem [shape: f32[10,128], index: 2, kind: input, shape index: {}]   ;;  %s3895_s3 = inlined_call_operand.vmem [shape: bf16[2,64,640], index: 3, kind: input, shape index: {}]   ;;  %s3896_s4 = inlined_call_operand.vmem [shape: bf16[2,256,64], index: 4, kind: input, shape index: {}]   ;;  %s3897_s5 = inlined_call_operand.vmem [shape: f32[2,8,256], index: 5, kind: input, shape index: {}]   ;;  %s3898_s6 = inlined_call_operand.vmem [shape: bf16[64,128], index: 6, kind: input, shape index: {}]   ;;  %s3899_s7 = inlined_call_operand.vmem [shape: f32[8,128], index: 7, kind: input, shape index: {}]   ;;  %s3900_s8 = inlined_call_operand.hbm [shape: f32[2,128], index: 8, kind: output, shape index: {}]  }
   0x1   :  { %v2975_v0 = vld [vmem:[%s3893_s1] sm:$0xff]   ;;  %144 = vmatprep.subr.bf16.mxu0 %v3188_v1  ;;  %362 = vmatprep.mubr.bf16.mxu1 %v3188_v1  ;;  %v2976_v2 = vld [vmem:[%s3893_s1 + $0x8] sm:$0xff]   ;;  %v2977_v3 = vld [vmem:[%s3893_s1 + $0x10] sm:$0xff]  }
   0x2   :  { %145 = vmatpush1.bf16.msra.mxu0 %v2975_v0  ;;  %v2978_v4 = vld [vmem:[%s3893_s1 + $0x18] sm:$0xff]   ;;  %v2979_v5 = vld [vmem:[%s3893_s1 + $0x20] sm:$0xff]   ;;  %v2980_v7 = vld [vmem:[%s3893_s1 + $0x28] sm:$0xff]  }
   0x3   :  { %146 = vmatprep.subr.bf16.mxu0 %v3188_v1  ;;  %v2989_v6 = vld [vmem:[%s3892_s0 + $0x4] ss:$8 sps:$4 sm:$0x1f]   ;;  %v2981_v8 = vld [vmem:[%s3893_s1 + $0x30] sm:$0xff]   ;;  %v2982_v9 = vld [vmem:[%s3893_s1 + $0x38] sm:$0xff]  }
   0x4   :  { %2512 = vmatprep.mubr.msk.bf16.mxu0 %vm140_vm0, %v2989_v6  ;;  %v2983_v10 = vld [vmem:[%s3893_s1 + $0x40] sm:$0xff]   ;;  %v2984_v11 = vld [vmem:[%s3893_s1 + $0x48] sm:$0xff]   ;;  %v2985_v12 = vld [vmem:[%s3893_s1 + $0x50] sm:$0xff]  }
   0x5   :  { %v2986_v13 = vld [vmem:[%s3893_s1 + $0x58] sm:$0xff]   ;;  %v2987_v14 = vld [vmem:[%s3892_s0] ss:$8 sps:$4 sm:$0x1f]  }
   0x6   :  { %147 = vmatpush1.bf16.msra.mxu0 %v2976_v2 }
   0x7   :  { %148 = vmatprep.subr.bf16.mxu0 %v3188_v1 }
   0xa   :  { %149 = vmatpush1.bf16.msra.mxu0 %v2977_v3 }
   0xb   :  { %150 = vmatprep.subr.bf16.mxu0 %v3188_v1 }
   0xe   :  { %151 = vmatpush1.bf16.msra.mxu0 %v2978_v4 }
   0xf   :  { %152 = vmatprep.subr.bf16.mxu0 %v3188_v1 }
  0x12   :  { %153 = vmatpush1.bf16.msra.mxu0 %v2979_v5 }
  0x13   :  { %154 = vmatprep.subr.bf16.mxu0 %v3188_v1 }
  0x16   :  { %155 = vmatpush1.bf16.msra.mxu0 %v2980_v7 }
  0x17   :  { %156 = vmatprep.subr.bf16.mxu0 %v3188_v1 }
  0x1a   :  { %157 = vmatpush1.bf16.msra.mxu0 %v2981_v8 }
  0x1b   :  { %158 = vmatprep.subr.bf16.mxu0 %v3188_v1 }
  0x1e   :  { %159 = vmatpush1.bf16.msra.mxu0 %v2982_v9 }
  0x1f   :  { %160 = vmatprep.subr.bf16.mxu0 %v3188_v1 }
  0x22   :  { %161 = vmatpush1.bf16.msra.mxu0 %v2983_v10 }
  0x23   :  { %162 = vmatprep.subr.bf16.mxu0 %v3188_v1 }
  0x26   :  { %163 = vmatpush1.bf16.msra.mxu0 %v2984_v11 }
  0x27   :  { %164 = vmatprep.subr.bf16.mxu0 %v3188_v1 }
  0x2a   :  { %165 = vmatpush1.bf16.msra.mxu0 %v2985_v12 }
  0x2b   :  { %166 = vmatprep.subr.bf16.mxu0 %v3188_v1 }
  0x2e   :  { %167 = vmatpush1.bf16.msra.mxu0 %v2986_v13 }
  0x31   :  { %177 = vmatmul.mubr.bf16.vlgmr.msra.gmra.mrb[0].mxu0 %v2987_v14 }
  0x32   :  { %13 = vsyncpa [#allocation3], 0  ;;  %v31_v15 = vld [vmem:[%s3894_s2] sm:$0xff]  ;;  %v32_v17 = vld [vmem:[%s3894_s2 + $0x8] sm:$0x3]  ;;  %vm246_vm1 = vcmask 517120   ;;  %v277_v60 = vlaneseq }
  0x33   :  { %v2990_v35 = vld [vmem:[%s3895_s3 + $0x4] ss:$20 sps:$4 sm:$0xff]   ;;  %v2992_v36 = vld [vmem:[%s3895_s3] ss:$20 sps:$4 sm:$0xff]   ;;  %v2995_v38 = vld [vmem:[%s3895_s3 + $0x28] ss:$20 sps:$4 sm:$0xff]  }
  0x34   :  { %330 = vmatprep.subr.bf16.mxu1 %v2990_v35  ;;  %v2993_v37 = vld [vmem:[%s3895_s3 + $0x2c] ss:$20 sps:$4 sm:$0xff]   ;;  %v2996_v39 = vld [vmem:[%s3895_s3 + $0x54] ss:$20 sps:$4 sm:$0xff]   ;;  %v2998_v40 = vld [vmem:[%s3895_s3 + $0x50] ss:$20 sps:$4 sm:$0xff]  }
  0x35   :  { %331 = vmatpush1.bf16.msra.mxu1 %v2992_v36  ;;  %v2999_v41 = vld [vmem:[%s3895_s3 + $0x7c] ss:$20 sps:$4 sm:$0xff]   ;;  %v3001_v42 = vld [vmem:[%s3895_s3 + $0x78] ss:$20 sps:$4 sm:$0xff]   ;;  %v233_v51 = vld [vmem:[%s3897_s5] ss:$0 sm:$0xff] }
  0x36   :  { %332 = vmatprep.subr.bf16.mxu1 %v2993_v37  ;;  %v234_v55 = vld [vmem:[%s3897_s5 + $0x1] ss:$0 sm:$0xff]  ;;  %s3189_s10 = smov 64   ;;  %v278_v61 = vshrl.u32 %v277_v60, 7  ;;  %vm387_vm2 = vcmask 261120   ;;  %vm501_vm3 = vcmask 1041408  }
  0x37   :  { %v2513_v63 = vld [vmem:[%s3897_s5 + $0x2] ss:$8 sm:$0x3]  ;;  %vm3370_vm4 = vmpackc.low %vm387_vm2, %vm387_vm2  ;;  %vm3190_vm5 = vmmov 1   ;;  %vm475_vm7 = vcmask 74752   ;;  %vm471_vm8 = vcmask 80896  }
  0x38   :  { %v3349_v62 = vsub.s32 0, %v278_v61  ;;  %v3354_v0 = vsub.s32 1, %v278_v61  ;;  %vm3374_vm6 = vmpackc.low %vm501_vm3, %vm3190_vm5  ;;  %s3191_s13 = smov 32   ;;  %s3192_s14 = smov 96   ;;  %vm3194_vm9 = vmmov 0  }
  0x39   :  { %333 = vmatpush1.bf16.msra.mxu1 %v2995_v38 }
  0x3a   :  { %334 = vmatprep.subr.bf16.mxu1 %v2996_v39  ;;  %v280_v2 = vrot.slane %v2513_v63, %v3349_v62  ;;  %v284_v4 = vrot.slane %v2513_v63, %v3354_v0 }
  0x3d   :  { %335 = vmatpush1.bf16.msra.mxu1 %v2998_v40 }
  0x3e   :  { %336 = vmatprep.subr.bf16.mxu1 %v2999_v41 }
  0x41   :  { %337 = vmatpush1.bf16.msra.mxu1 %v3001_v42 }
 0x104   :  { %v178_v16 = vpop.f32.mrb[0].mxu0 }
 0x105   :  { %v3304_v18 = vadd.f32 %v178_v16, %v31_v15  ;;  %v180_v19 = vpop.f32.mrb[1].mxu0 }
 0x106   :  { %v181_v20 = vpop.f32.mrb[2].mxu0 }
 0x107   :  { %v3306_v21 = vadd.f32 %v181_v20, %v32_v17  ;;  %v183_v22 = vpop.f32.mrb[3].mxu0  ;;  %v243_v23 = vsel %vm140_vm0, %v3304_v18, 0.0 }
 0x108   :  { %244 = vadd.xlane.f32.xlu0 %v243_v23  ;;  %v3047_v22 = vld [vmem:[%s3895_s3 + $0xf8] ss:$20 sps:$4 sm:$0xff]  }
 0x109   :  { %v247_v24 = vsel %vm246_vm1, %v3306_v21, 0.0 }
 0x10c   :  { %248 = vadd.xlane.f32.xlu0 %v247_v24 }
 0x195   :  { %v245_v25 = vpop.xlane.xlu0 %244 }
 0x196   :  { %v251_v26 = vmul.f32 0.015625, %v245_v25 }
 0x198   :  { %v253_v27 = vsub.f32 %v3304_v18, %v251_v26 }
 0x199   :  { %v249_v28 = vpop.xlane.xlu0 %248 }
 0x19a   :  { %v252_v29 = vmul.f32 0.015625, %v249_v28  ;;  %v255_v30 = vmul.f32 %v253_v27, %v253_v27 }
 0x19c   :  { %v254_v31 = vsub.f32 %v3306_v21, %v252_v29  ;;  %v257_v32 = vsel %vm140_vm0, %v255_v30, 0.0 }
 0x19d   :  { %258 = vadd.xlane.f32.xlu1 %v257_v32 }
 0x19e   :  { %v256_v33 = vmul.f32 %v254_v31, %v254_v31 }
 0x1a0   :  { %v260_v34 = vsel %vm246_vm1, %v256_v33, 0.0 }
 0x1a1   :  { %261 = vadd.xlane.f32.xlu1 %v260_v34 }
 0x1b2   :  { %381 = vrot.lane.b32.xlu1 %v31_v15, %s3189_s10 }
 0x1b6   :  { %383 = vrot.lane.b32.xlu1 %v32_v17, %s3189_s10 }
 0x22a   :  { %v259_v43 = vpop.xlane.xlu1 %258 }
 0x22b   :  { %v263_v44 = vmul.f32 0.015625, %v259_v43 }
 0x22d   :  { %v265_v45 = vadd.f32 1e-06, %v263_v44 }
 0x22e   :  { %v262_v46 = vpop.xlane.xlu1 %261 }
 0x22f   :  { %3082 = vrsqrt.f32 %v265_v45  ;;  %v264_v47 = vmul.f32 0.015625, %v262_v46  ;;  %v3002_v45 = vld [vmem:[%s3895_s3 + $0x8] ss:$20 sps:$4 sm:$0xff]   ;;  %v3193_v46 = vmov 0.0  }
 0x230   :  { %2824 = vmatprep.subr.bf16.mxu0 %v3193_v46  ;;  %2828 = vmatprep.mubr.msk.bf16.mxu0 %vm3194_vm9, %v3193_v46 }
 0x231   :  { %v266_v48 = vadd.f32 1e-06, %v264_v47  ;;  %2825 = vmatpush3.bf16.msra.mxu0 %v3002_v45 }
 0x232   :  { %v3387_v23 = vpop.permute.xlu1 %381  ;;  %2826 = vmatprep.subr.bf16.mxu0 %v3193_v46 }
 0x233   :  { %3084 = vrsqrt.f32 %v266_v48 }
 0x236   :  { %v3389_v24 = vpop.permute.xlu1 %383 }
 0x239   :  { %v3083_v49 = vpop.eup %3082 }
 0x23a   :  { %v269_v50 = vmul.f32 %v3083_v49, %v253_v27 }
 0x23c   :  { %v271_v54 = vmul.f32 %v269_v50, %v233_v51 }
 0x23d   :  { %v3085_v52 = vpop.eup %3084 }
 0x23e   :  { %v270_v53 = vmul.f32 %v3085_v52, %v254_v31  ;;  %v273_v57 = vadd.f32 %v271_v54, %v234_v55 }
 0x240   :  { %v272_v56 = vmul.f32 %v270_v53, %v233_v51 }
 0x242   :  { %v274_v58 = vadd.f32 %v272_v56, %v234_v55  ;;  %v3003_v55 = vld [vmem:[%s3895_s3 + $0x30] ss:$20 sps:$4 sm:$0xff]  }
 0x243   :  { %2827 = vmatpush3.bf16.msra.mxu0 %v3003_v55 }
 0x244   :  { %v275_v59 = vpack.c.bf16 %v274_v58, %v273_v57 }
 0x246   :  { %2523 = vmatmul.mubr.msk.bf16.vlgmr.msra.gmra.mrb[0].mxu1 %vm140_vm0, %v275_v59 }
 0x319   :  { %v364_v3 = vpop.f32.mrb[0].mxu1 }
 0x31a   :  { %v365_v5 = vadd.f32 %v364_v3, %v280_v2  ;;  %v366_v6 = vpop.f32.mrb[1].mxu1 }
 0x31b   :  { %v368_v7 = vpop.f32.mrb[2].mxu1  ;;  %v3359_v10 = vadd.f32 %v366_v6, %v284_v4 }
 0x31c   :  { %v369_v8 = vadd.f32 %v368_v7, %v280_v2  ;;  %v370_v9 = vpop.f32.mrb[3].mxu1  ;;  %2792 = vmatprep.mubr.msk.f32.mxu1 %vm387_vm2, %v365_v5 }
 0x31d   :  { %v3361_v11 = vadd.f32 %v370_v9, %v284_v4 }
 0x31e   :  { %v2945_v12 = vpack.i.bf16 %v369_v8, %v365_v5 }
 0x31f   :  { %v2955_v13 = vpack.i.bf16 %v3361_v11, %v3359_v10  ;;  %v2894_v14 = vpack.c.bf16 %v3361_v11, %v3359_v10 }
 0x320   :  { %2946 = vrot.lane.b32.xlu0 %v2945_v12, %s3189_s10 }
 0x392   :  { %v2947_v15 = vpop.permute.xlu0 %2946 }
 0x393   :  { %v2949_v16 = vunpack.i.h.bf16 %v2947_v15  ;;  %v2948_v17 = vunpack.i.l.bf16 %v2947_v15 }
 0x395   :  { %v2888_v20 = vpack.c.bf16 %v2949_v16, %v2948_v17 }
 0x397   :  { %2890 = vmatprep.subr.msk.bf16.mxu1 %vm3370_vm4, %v2888_v20 }
 0x398   :  { %2893 = vmatpush3.bf16.xpose.msk.msra.mxu1 %vm3370_vm4, %v2888_v20 }
 0x399   :  { %2896 = vmatprep.subr.msk.bf16.mxu1 %vm3374_vm6, %v2894_v14 }
 0x39f   :  { %2793 = vmatmul.mubr.msk.f32.vlgmr.msra.gmra.mrb[4].mxu1 %vm387_vm2, %v369_v8 }
 0x3a0   :  { %2899 = vmatpush3.bf16.msk.msra.mxu1 %vm3374_vm6, %v2894_v14 }
 0x472   :  { %v2794_v25 = vpop.f32.mrb[4].mxu1 }
 0x473   :  { %v462_v26 = vpop.f32.mrb[5].mxu1  ;;  %v468_v27 = vadd.f32 %v2794_v25, %v3389_v24 }
 0x474   :  { %v463_v28 = vadd.f32 %v462_v26, %v3387_v23 }
 0x475   :  { %v476_v29 = vsel %vm475_vm7, %v468_v27, -inf }
 0x476   :  { %477 = vmax.xlane.f32.xlu0 %v476_v29  ;;  %v472_v30 = vsel %vm471_vm8, %v463_v28, -inf }
 0x477   :  { %473 = vmax.xlane.f32.xlu1 %v472_v30 }
 0x488   :  { %2951 = vrot.lane.b32.xlu1 %v2945_v12, %s3191_s13 }
 0x48c   :  { %587 = vrot.lane.b32.xlu1 %v369_v8, %s3192_s14 }
 0x503   :  { %v478_v31 = vpop.xlane.xlu0 %477 }
 0x504   :  { %v480_v32 = vsub.f32 %v468_v27, %v478_v31  ;;  %v474_v33 = vpop.xlane.xlu1 %473 }
 0x505   :  { %v479_v34 = vsub.f32 %v463_v28, %v474_v33 }
 0x506   :  { %v483_v35 = vmul.f32 1.442695, %v480_v32 }
 0x507   :  { %v481_v36 = vmul.f32 1.442695, %v479_v34 }
 0x508   :  { %v2952_v37 = vpop.permute.xlu1 %2951 }
 0x509   :  { %3086 = vpow2.f32 %v481_v36  ;;  %v2954_v38 = vunpack.i.h.bf16 %v2952_v37  ;;  %v2953_v39 = vunpack.i.l.bf16 %v2952_v37 }
 0x50a   :  { %3088 = vpow2.f32 %v483_v35  ;;  %v3005_v35 = vld [vmem:[%s3895_s3 + $0x80] ss:$20 sps:$4 sm:$0xff]  }
 0x50b   :  { %v2900_v40 = vpack.c.bf16 %v2954_v38, %v2953_v39 }
 0x50c   :  { %v588_v54 = vpop.permute.xlu1 %587 }
 0x50d   :  { %2902 = vmatprep.subr.msk.bf16.mxu1 %vm3370_vm4, %v2900_v40 }
 0x513   :  { %v3087_v41 = vpop.eup %3086 }
 0x514   :  { %v485_v42 = vsel %vm471_vm8, %v3087_v41, 0.0  ;;  %v3089_v43 = vpop.eup %3088 }
 0x515   :  { %486 = vadd.xlane.f32.xlu0 %v485_v42  ;;  %v488_v44 = vsel %vm475_vm7, %v3089_v43, 0.0  ;;  %v237_v42 = vld [vmem:[%s3897_s5 + $0x3] ss:$0 sm:$0xff] }
 0x519   :  { %489 = vadd.xlane.f32.xlu0 %v488_v44 }
 0x52f   :  { %585 = vrot.lane.b32.xlu0 %v365_v5, %s3192_s14 }
 0x5a2   :  { %v487_v47 = vpop.xlane.xlu0 %486 }
 0x5a3   :  { %3090 = vrcp.f32 %v487_v47 }
 0x5a6   :  { %v490_v48 = vpop.xlane.xlu0 %489 }
 0x5a7   :  { %3092 = vrcp.f32 %v490_v48 }
 0x5aa   :  { %v586_v53 = vpop.permute.xlu0 %585 }
 0x5ad   :  { %v3091_v49 = vpop.eup %3090 }
 0x5ae   :  { %v493_v50 = vmul.f32 %v3091_v49, %v3087_v41 }
 0x5b0   :  { %2799 = vmatprep.mubr.msk.f32.mxu1 %vm471_vm8, %v493_v50 }
 0x5b1   :  { %v3093_v51 = vpop.eup %3092 }
 0x5b2   :  { %v494_v52 = vmul.f32 %v3093_v51, %v3089_v43 }
 0x5b4   :  { %2800 = vmatmul.mubr.msk.f32.vlgmr.msra.gmra.mrb[6].mxu1 %vm471_vm8, %v494_v52 }
 0x5b5   :  { %2905 = vmatpush3.bf16.xpose.msk.msra.mxu1 %vm3370_vm4, %v2900_v40  ;;  %2806 = vmatprep.mubr.msk.f32.mxu1 %vm387_vm2, %v586_v53 }
 0x5bc   :  { %2807 = vmatmul.mubr.msk.f32.vlgmr.msra.gmra.mrb[8].mxu1 %vm387_vm2, %v588_v54 }
 0x687   :  { %v2801_v56 = vpop.f32.mrb[6].mxu1 }
 0x688   :  { %v571_v57 = vpop.f32.mrb[7].mxu1 }
 0x689   :  { %v584_v58 = vpack.c.bf16 %v2801_v56, %v571_v57 }
 0x68b   :  { %2829 = vmatmul.mubr.msk.bf16.vlgmr.msra.gmra.mrb[4].mxu0 %vm387_vm2, %v584_v58 }
 0x68f   :  { %v2808_v59 = vpop.f32.mrb[8].mxu1 }
 0x690   :  { %v673_v60 = vadd.f32 %v2808_v59, %v3389_v24  ;;  %v667_v61 = vpop.f32.mrb[9].mxu1 }
 0x691   :  { %v668_v63 = vadd.f32 %v667_v61, %v3387_v23  ;;  %v3008_v61 = vld [vmem:[%s3895_s3 + $0x10] ss:$20 sps:$4 sm:$0xff]  }
 0x692   :  { %v679_v2 = vsel %vm475_vm7, %v673_v60, -inf }
 0x693   :  { %680 = vmax.xlane.f32.xlu0 %v679_v2  ;;  %v676_v3 = vsel %vm471_vm8, %v668_v63, -inf  ;;  %v3011_v2 = vld [vmem:[%s3895_s3 + $0x38] ss:$20 sps:$4 sm:$0xff]  }
 0x694   :  { %677 = vmax.xlane.f32.xlu1 %v676_v3  ;;  %v3009_v3 = vld [vmem:[%s3895_s3 + $0x34] ss:$20 sps:$4 sm:$0xff]  }
 0x720   :  { %v681_v4 = vpop.xlane.xlu0 %680 }
 0x721   :  { %v683_v5 = vsub.f32 %v673_v60, %v681_v4  ;;  %v678_v6 = vpop.xlane.xlu1 %677  ;;  %v3014_v4 = vld [vmem:[%s3895_s3 + $0x60] ss:$20 sps:$4 sm:$0xff]  }
 0x722   :  { %v682_v7 = vsub.f32 %v668_v63, %v678_v6  ;;  %v3006_v63 = vld [vmem:[%s3895_s3 + $0xc] ss:$20 sps:$4 sm:$0xff]   ;;  %v3015_v6 = vld [vmem:[%s3895_s3 + $0x84] ss:$20 sps:$4 sm:$0xff]  }
 0x723   :  { %v686_v8 = vmul.f32 1.442695, %v683_v5  ;;  %v3012_v5 = vld [vmem:[%s3895_s3 + $0x5c] ss:$20 sps:$4 sm:$0xff]  }
 0x724   :  { %v684_v9 = vmul.f32 1.442695, %v682_v7  ;;  %v3017_v7 = vld [vmem:[%s3895_s3 + $0x88] ss:$20 sps:$4 sm:$0xff]  }
 0x725   :  { %3094 = vpow2.f32 %v686_v8 }
 0x726   :  { %3096 = vpow2.f32 %v684_v9 }
 0x72f   :  { %v3095_v12 = vpop.eup %3094 }
 0x730   :  { %v3097_v14 = vpop.eup %3096  ;;  %v691_v15 = vsel %vm475_vm7, %v3095_v12, 0.0 }
 0x731   :  { %692 = vadd.xlane.f32.xlu1 %v691_v15  ;;  %v688_v16 = vsel %vm471_vm8, %v3097_v14, 0.0 }
 0x732   :  { %689 = vadd.xlane.f32.xlu0 %v688_v16 }
 0x748   :  { %2956 = vrot.lane.b32.xlu0 %v2955_v13, %s3192_s14  ;;  %v3004_v13 = vld [vmem:[%s3895_s3 + $0x58] ss:$20 sps:$4 sm:$0xff]  }
 0x75e   :  { %v897_v17 = vpop.f32.mrb[4].mxu0 }
 0x75f   :  { %v2830_v20 = vpop.f32.mrb[5].mxu0 }
 0x760   :  { %v900_v25 = vpop.f32.mrb[6].mxu0 }
 0x761   :  { %v2831_v26 = vpop.f32.mrb[7].mxu0 }
 0x7be   :  { %v693_v27 = vpop.xlane.xlu1 %692 }
 0x7bf   :  { %3098 = vrcp.f32 %v693_v27  ;;  %v690_v28 = vpop.xlane.xlu0 %689 }
 0x7c0   :  { %3100 = vrcp.f32 %v690_v28 }
 0x7c3   :  { %v2957_v29 = vpop.permute.xlu0 %2956 }
 0x7c4   :  { %v2959_v30 = vunpack.i.h.bf16 %v2957_v29  ;;  %v2958_v31 = vunpack.i.l.bf16 %v2957_v29  ;;  %v239_v29 = vld [vmem:[%s3897_s5 + $0x5] ss:$0 sm:$0xff] }
 0x7c6   :  { %v2906_v32 = vpack.c.bf16 %v2959_v30, %v2958_v31 }
 0x7c8   :  { %2908 = vmatprep.subr.msk.bf16.mxu1 %vm3374_vm6, %v2906_v32 }
 0x7c9   :  { %v3099_v33 = vpop.eup %3098  ;;  %2911 = vmatpush3.bf16.msk.msra.mxu1 %vm3374_vm6, %v2906_v32 }
 0x7ca   :  { %v3101_v10 = vpop.eup %3100  ;;  %2816 = vmatprep.subr.bf16.mxu1 %v3193_v46  ;;  %v697_v34 = vmul.f32 %v3099_v33, %v3095_v12 }
 0x7cb   :  { %v696_v11 = vmul.f32 %v3101_v10, %v3097_v14  ;;  %v3018_v10 = vld [vmem:[%s3896_s4 + $0x40] sm:$0xff]  }
 0x7cc   :  { %2717 = vmatprep.subr.bf16.mxu0 %v3018_v10 }
 0x7cd   :  { %2813 = vmatprep.mubr.msk.f32.mxu1 %vm471_vm8, %v696_v11  ;;  %v3019_v11 = vld [vmem:[%s3896_s4] sm:$0xff]  }
 0x7ce   :  { %2814 = vmatmul.mubr.msk.f32.vlgmr.msra.gmra.mrb[10].mxu1 %vm471_vm8, %v697_v34  ;;  %2718 = vmatpush3.bf16.msra.mxu0 %v3019_v11  ;;  %v3021_v34 = vld [vmem:[%s3896_s4 + $0x8] sm:$0xff]  }
 0x7cf   :  { %2817 = vmatpush3.bf16.msra.mxu1 %v3004_v13  ;;  %2820 = vmatprep.mubr.msk.bf16.mxu1 %vm3194_vm9, %v3193_v46  ;;  %v3020_v13 = vld [vmem:[%s3896_s4 + $0x48] sm:$0xff]  }
 0x7d0   :  { %2818 = vmatprep.subr.bf16.mxu1 %v3193_v46  ;;  %2719 = vmatprep.subr.bf16.mxu0 %v3020_v13 }
 0x7d2   :  { %2720 = vmatpush3.bf16.msra.mxu0 %v3021_v34 }
 0x7d3   :  { %2819 = vmatpush3.bf16.msra.mxu1 %v3005_v35  ;;  %v3022_v35 = vld [vmem:[%s3896_s4 + $0x50] sm:$0xff]  }
 0x7d4   :  { %993 = vmatprep.subr.bf16.mxu1 %v3008_v61  ;;  %2721 = vmatprep.subr.bf16.mxu0 %v3022_v35 }
 0x8a1   :  { %v2815_v36 = vpop.f32.mrb[10].mxu1 }
 0x8a2   :  { %v778_v37 = vpop.f32.mrb[11].mxu1 }
 0x8a3   :  { %v791_v38 = vpack.c.bf16 %v2815_v36, %v778_v37  ;;  %v3023_v36 = vld [vmem:[%s3896_s4 + $0x10] sm:$0xff]   ;;  %v3024_v37 = vld [vmem:[%s3896_s4 + $0x58] sm:$0xff]  }
 0x8a4   :  { %2722 = vmatpush3.bf16.msra.mxu0 %v3023_v36 }
 0x8a5   :  { %2821 = vmatmul.mubr.msk.bf16.vlgmr.msra.gmra.mrb[12].mxu1 %vm387_vm2, %v791_v38  ;;  %v3025_v38 = vld [vmem:[%s3896_s4 + $0x18] sm:$0xff]   ;;  %2723 = vmatprep.subr.bf16.mxu0 %v3024_v37 }
 0x8a6   :  { %1025 = vmatprep.mubr.bf16.mxu1 %v3188_v1  ;;  %994 = vmatpush1.bf16.msra.mxu1 %v3006_v63 }
 0x8a7   :  { %995 = vmatprep.subr.bf16.mxu1 %v3011_v2 }
 0x8a8   :  { %2724 = vmatpush3.bf16.msra.mxu0 %v3025_v38 }
 0x8aa   :  { %996 = vmatpush1.bf16.msra.mxu1 %v3009_v3 }
 0x8ab   :  { %997 = vmatprep.subr.bf16.mxu1 %v3014_v4 }
 0x8ae   :  { %998 = vmatpush1.bf16.msra.mxu1 %v3012_v5 }
 0x8af   :  { %999 = vmatprep.subr.bf16.mxu1 %v3017_v7 }
 0x8b2   :  { %1000 = vmatpush1.bf16.msra.mxu1 %v3015_v6 }
 0x978   :  { %v841_v39 = vpop.f32.mrb[12].mxu1 }
 0x979   :  { %v898_v40 = vadd.f32 %v897_v17, %v841_v39  ;;  %v2822_v41 = vpop.f32.mrb[13].mxu1  ;;  %v3026_v39 = vld [vmem:[%s3896_s4 + $0x60] sm:$0xff]  }
 0x97a   :  { %v844_v43 = vpop.f32.mrb[14].mxu1  ;;  %2725 = vmatprep.subr.bf16.mxu0 %v3026_v39  ;;  %v3028_v41 = vld [vmem:[%s3896_s4 + $0x68] sm:$0xff]  }
 0x97b   :  { %v904_v44 = vadd.f32 %v898_v40, %v3304_v18  ;;  %v901_v45 = vadd.f32 %v900_v25, %v844_v43  ;;  %v2823_v47 = vpop.f32.mrb[15].mxu1  ;;  %v238_v25 = vld [vmem:[%s3897_s5 + $0x4] ss:$0 sm:$0xff]  ;;  %v3030_v43 = vld [vmem:[%s3896_s4 + $0x70] sm:$0xff]  }
 0x97c   :  { %v3027_v40 = vld [vmem:[%s3896_s4 + $0x20] sm:$0xff]   ;;  %v3033_v47 = vld [vmem:[%s3896_s4 + $0x38] sm:$0xff]  }
 0x97d   :  { %v3451_v48 = vadd.f32 %v904_v44, %v237_v42  ;;  %v905_v49 = vadd.f32 %v901_v45, %v3306_v21  ;;  %2726 = vmatpush3.bf16.msra.mxu0 %v3027_v40  ;;  %v3031_v44 = vld [vmem:[%s3896_s4 + $0x30] sm:$0xff]   ;;  %v3032_v45 = vld [vmem:[%s3896_s4 + $0x78] sm:$0xff]  }
 0x97e   :  { %2727 = vmatprep.subr.bf16.mxu0 %v3028_v41 }
 0x97f   :  { %v3454_v50 = vadd.f32 %v905_v49, %v237_v42  ;;  %v908_v51 = vsel %vm140_vm0, %v3451_v48, 0.0  ;;  %v3029_v42 = vld [vmem:[%s3896_s4 + $0x28] sm:$0xff]  }
 0x980   :  { %909 = vadd.xlane.f32.xlu1 %v908_v51  ;;  %v2514_v49 = vld [vmem:[%s3897_s5 + $0x6] ss:$8 sm:$0x3] }
 0x981   :  { %v911_v52 = vsel %vm246_vm1, %v3454_v50, 0.0  ;;  %2728 = vmatpush3.bf16.msra.mxu0 %v3029_v42  ;;  %v943_v51 = vrot.slane %v2514_v49, %v3349_v62 }
 0x982   :  { %2729 = vmatprep.subr.bf16.mxu0 %v3030_v43 }
 0x984   :  { %912 = vadd.xlane.f32.xlu1 %v911_v52  ;;  %v947_v52 = vrot.slane %v2514_v49, %v3354_v0 }
 0x985   :  { %2730 = vmatpush3.bf16.msra.mxu0 %v3031_v44 }
 0x986   :  { %2731 = vmatprep.subr.bf16.mxu0 %v3032_v45 }
 0x989   :  { %2732 = vmatpush3.bf16.msra.mxu0 %v3033_v47 }
 0xa0d   :  { %v910_v53 = vpop.xlane.xlu1 %909 }
 0xa0e   :  { %v914_v54 = vmul.f32 0.015625, %v910_v53 }
 0xa10   :  { %v916_v18 = vsub.f32 %v3451_v48, %v914_v54 }
 0xa11   :  { %v913_v55 = vpop.xlane.xlu1 %912 }
 0xa12   :  { %v915_v56 = vmul.f32 0.015625, %v913_v55  ;;  %v918_v57 = vmul.f32 %v916_v18, %v916_v18 }
 0xa14   :  { %v917_v58 = vsub.f32 %v3454_v50, %v915_v56  ;;  %v920_v21 = vsel %vm140_vm0, %v918_v57, 0.0 }
 0xa15   :  { %921 = vadd.xlane.f32.xlu1 %v920_v21 }
 0xa16   :  { %v919_v59 = vmul.f32 %v917_v58, %v917_v58 }
 0xa18   :  { %v923_v60 = vsel %vm246_vm1, %v919_v59, 0.0 }
 0xa19   :  { %924 = vadd.xlane.f32.xlu1 %v923_v60 }
 0xaa2   :  { %v922_v8 = vpop.xlane.xlu1 %921 }
 0xaa3   :  { %v926_v9 = vmul.f32 0.015625, %v922_v8 }
 0xaa5   :  { %v928_v12 = vadd.f32 1e-06, %v926_v9 }
 0xaa6   :  { %v925_v14 = vpop.xlane.xlu1 %924 }
 0xaa7   :  { %3102 = vrsqrt.f32 %v928_v12  ;;  %v927_v15 = vmul.f32 0.015625, %v925_v14 }
 0xaa9   :  { %v929_v16 = vadd.f32 1e-06, %v927_v15 }
 0xaab   :  { %3104 = vrsqrt.f32 %v929_v16 }
 0xab1   :  { %v3103_v17 = vpop.eup %3102 }
 0xab2   :  { %v932_v20 = vmul.f32 %v3103_v17, %v916_v18 }
 0xab4   :  { %v934_v27 = vmul.f32 %v932_v20, %v238_v25 }
 0xab5   :  { %v3105_v26 = vpop.eup %3104 }
 0xab6   :  { %v933_v28 = vmul.f32 %v3105_v26, %v917_v58  ;;  %v936_v31 = vadd.f32 %v934_v27, %v239_v29 }
 0xab8   :  { %v935_v30 = vmul.f32 %v933_v28, %v238_v25 }
 0xaba   :  { %v937_v32 = vadd.f32 %v935_v30, %v239_v29 }
 0xabc   :  { %v938_v33 = vpack.c.bf16 %v937_v32, %v936_v31 }
 0xabe   :  { %2552 = vmatmul.mubr.msk.bf16.vlgmr.msra.gmra.mrb[16].mxu1 %vm140_vm0, %v938_v33 }
 0xabf   :  { %1465 = vmatprep.mubr.bf16.mxu1 %v3188_v1 }
 0xb91   :  { %v1027_v53 = vpop.f32.mrb[16].mxu1 }
 0xb92   :  { %v3549_v54 = vadd.f32 %v1027_v53, %v943_v51  ;;  %v1029_v18 = vpop.f32.mrb[17].mxu1 }
 0xb93   :  { %v3551_v55 = vadd.f32 %v1029_v18, %v947_v52  ;;  %v1031_v56 = vpop.f32.mrb[18].mxu1 }
 0xb94   :  { %v3554_v57 = vmul.f32 0.70710677, %v3549_v54  ;;  %v3556_v58 = vadd.f32 %v1031_v56, %v943_v51  ;;  %v1033_v21 = vpop.f32.mrb[19].mxu1 }
 0xb95   :  { %v3559_v59 = vmul.f32 0.70710677, %v3551_v55  ;;  %v3565_v63 = vadd.f32 %v1033_v21, %v947_v52 }
 0xb96   :  { %v1052_v60 = vand.u32 2147483647, %v3554_v57  ;;  %v3563_v61 = vmul.f32 0.70710677, %v3556_v58  ;;  %vm1044_vm10 = vcmp.ge.f32.partialorder %v3554_v57, 0.0 }
 0xb97   :  { %v1053_v2 = vand.u32 2147483647, %v3559_v59  ;;  %v3570_v7 = vmul.f32 0.70710677, %v3565_v63  ;;  %vm1045_vm11 = vcmp.ge.f32.partialorder %v3559_v59, 0.0 }
 0xb98   :  { %v1056_v3 = vmul.f32 0.3275911, %v1052_v60  ;;  %v1054_v5 = vand.u32 2147483647, %v3563_v61  ;;  %v1108_v17 = vsub.f32 0.0, %v1052_v60  ;;  %vm1046_vm12 = vcmp.ge.f32.partialorder %v3563_v61, 0.0 }
 0xb99   :  { %v1057_v4 = vmul.f32 0.3275911, %v1053_v2  ;;  %v1055_v12 = vand.u32 2147483647, %v3570_v7  ;;  %v1109_v20 = vsub.f32 0.0, %v1053_v2  ;;  %vm1047_vm13 = vcmp.ge.f32.partialorder %v3570_v7, 0.0 }
 0xb9a   :  { %v1060_v6 = vadd.f32 1.0, %v1056_v3  ;;  %v1058_v9 = vmul.f32 0.3275911, %v1054_v5  ;;  %v1112_v26 = vmul.f32 %v1108_v17, %v1052_v60  ;;  %v1110_v27 = vsub.f32 0.0, %v1054_v5 }
 0xb9b   :  { %v1061_v8 = vadd.f32 1.0, %v1057_v4  ;;  %v1059_v15 = vmul.f32 0.3275911, %v1055_v12  ;;  %v1113_v30 = vmul.f32 %v1109_v20, %v1053_v2  ;;  %v1111_v32 = vsub.f32 0.0, %v1055_v12 }
 0xb9c   :  { %3106 = vrcp.f32 %v1060_v6  ;;  %v1062_v14 = vadd.f32 1.0, %v1058_v9  ;;  %v1116_v11 = vmul.f32 1.442695, %v1112_v26  ;;  %v1114_v34 = vmul.f32 %v1110_v27, %v1054_v5 }
 0xb9d   :  { %3108 = vrcp.f32 %v1061_v8  ;;  %v1063_v16 = vadd.f32 1.0, %v1059_v15  ;;  %v1118_v36 = vmul.f32 1.442695, %v1113_v30  ;;  %v1115_v40 = vmul.f32 %v1111_v32, %v1055_v12 }
 0xb9e   :  { %3110 = vrcp.f32 %v1062_v14  ;;  %v1120_v45 = vmul.f32 1.442695, %v1114_v34  ;;  %v3195_v34 = vmov -1.0   ;;  %v1039_v7 = vmul.f32 0.5, %v3565_v63 }
 0xb9f   :  { %3112 = vrcp.f32 %v1063_v16  ;;  %v1122_v53 = vmul.f32 1.442695, %v1115_v40 }
 0xba0   :  { %3114 = vpow2.f32 %v1116_v11 }
 0xba1   :  { %3116 = vpow2.f32 %v1118_v36 }
 0xba2   :  { %3118 = vpow2.f32 %v1120_v45  ;;  %v1036_v45 = vmul.f32 0.5, %v3549_v54 }
 0xba3   :  { %3120 = vpow2.f32 %v1122_v53 }
 0xba6   :  { %v3107_v25 = vpop.eup %3106 }
 0xba7   :  { %v3109_v28 = vpop.eup %3108  ;;  %v1072_v29 = vmul.f32 1.0614054, %v3107_v25 }
 0xba8   :  { %v1073_v31 = vmul.f32 1.0614054, %v3109_v28  ;;  %v3111_v10 = vpop.eup %3110 }
 0xba9   :  { %v1076_v33 = vadd.f32 -1.4531521, %v1072_v29  ;;  %v1074_v37 = vmul.f32 1.0614054, %v3111_v10  ;;  %v3113_v38 = vpop.eup %3112 }
 0xbaa   :  { %v1077_v13 = vadd.f32 -1.4531521, %v1073_v31  ;;  %v1075_v43 = vmul.f32 1.0614054, %v3113_v38  ;;  %v3115_v17 = vpop.eup %3114 }
 0xbab   :  { %v1080_v35 = vmul.f32 %v3107_v25, %v1076_v33  ;;  %v1078_v42 = vadd.f32 -1.4531521, %v1074_v37  ;;  %v3117_v26 = vpop.eup %3116 }
 0xbac   :  { %v1081_v39 = vmul.f32 %v3109_v28, %v1077_v13  ;;  %v1079_v51 = vadd.f32 -1.4531521, %v1075_v43  ;;  %v3119_v13 = vpop.eup %3118 }
 0xbad   :  { %v1084_v41 = vadd.f32 1.4214138, %v1080_v35  ;;  %v1082_v49 = vmul.f32 %v3111_v10, %v1078_v42  ;;  %v3121_v57 = vpop.eup %3120 }
 0xbae   :  { %v1085_v44 = vadd.f32 1.4214138, %v1081_v39  ;;  %v1083_v21 = vmul.f32 %v3113_v38, %v1079_v51  ;;  %v1049_v39 = vsel %vm1045_vm11, 1.0, %v3195_v34 }
 0xbaf   :  { %v1088_v47 = vmul.f32 %v3107_v25, %v1084_v41  ;;  %v1086_v56 = vadd.f32 1.4214138, %v1082_v49 }
 0xbb0   :  { %v1089_v52 = vmul.f32 %v3109_v28, %v1085_v44  ;;  %v1087_v4 = vadd.f32 1.4214138, %v1083_v21 }
 0xbb1   :  { %v1092_v18 = vadd.f32 -0.28449672, %v1088_v47  ;;  %v1090_v3 = vmul.f32 %v3111_v10, %v1086_v56  ;;  %v1051_v47 = vsel %vm1047_vm13, 1.0, %v3195_v34 }
 0xbb2   :  { %v1093_v60 = vadd.f32 -0.28449672, %v1089_v52  ;;  %v1091_v9 = vmul.f32 %v3113_v38, %v1087_v4  ;;  %v1037_v52 = vmul.f32 0.5, %v3551_v55 }
 0xbb3   :  { %v1096_v2 = vmul.f32 %v3107_v25, %v1092_v18  ;;  %v1094_v8 = vadd.f32 -0.28449672, %v1090_v3 }
 0xbb4   :  { %v1097_v5 = vmul.f32 %v3109_v28, %v1093_v60  ;;  %v1095_v16 = vadd.f32 -0.28449672, %v1091_v9 }
 0xbb5   :  { %v1100_v6 = vadd.f32 0.2548296, %v1096_v2  ;;  %v1098_v15 = vmul.f32 %v3111_v10, %v1094_v8 }
 0xbb6   :  { %v1101_v12 = vadd.f32 0.2548296, %v1097_v5  ;;  %v1099_v30 = vmul.f32 %v3113_v38, %v1095_v16 }
 0xbb7   :  { %v1104_v14 = vmul.f32 %v3107_v25, %v1100_v6  ;;  %v1102_v29 = vadd.f32 0.2548296, %v1098_v15  ;;  %v1048_v25 = vsel %vm1044_vm10, 1.0, %v3195_v34 }
 0xbb8   :  { %v1105_v20 = vmul.f32 %v3109_v28, %v1101_v12  ;;  %v1103_v11 = vadd.f32 0.2548296, %v1099_v30 }
 0xbb9   :  { %v1124_v27 = vmul.f32 %v3115_v17, %v1104_v14  ;;  %v1106_v33 = vmul.f32 %v3111_v10, %v1102_v29  ;;  %v1050_v10 = vsel %vm1046_vm12, 1.0, %v3195_v34 }
 0xbba   :  { %v1125_v31 = vmul.f32 %v3117_v26, %v1105_v20  ;;  %v1107_v37 = vmul.f32 %v3113_v38, %v1103_v11  ;;  %v1038_v38 = vmul.f32 0.5, %v3556_v58  ;;  %v242_v58 = vld [vmem:[%s3897_s5 + $0x7] ss:$0 sm:$0xff]  ;;  %v3034_v11 = vld [vmem:[%s3895_s3 + $0xa0] ss:$20 sps:$4 sm:$0xff]  }
 0xbbb   :  { %v1128_v32 = vsub.f32 1.0, %v1124_v27  ;;  %v1126_v28 = vmul.f32 %v3119_v13, %v1106_v33  ;;  %v3036_v33 = vld [vmem:[%s3895_s3 + $0xa4] ss:$20 sps:$4 sm:$0xff]   ;;  %v3039_v13 = vld [vmem:[%s3895_s3 + $0xcc] ss:$20 sps:$4 sm:$0xff]  }
 0xbbc   :  { %v1129_v35 = vsub.f32 1.0, %v1125_v31  ;;  %v1127_v59 = vmul.f32 %v3121_v57, %v1107_v37  ;;  %1433 = vmatprep.subr.bf16.mxu1 %v3036_v33  ;;  %v3045_v37 = vld [vmem:[%s3895_s3 + $0x11c] ss:$20 sps:$4 sm:$0xff]  }
 0xbbd   :  { %v1132_v36 = vmul.f32 %v1128_v32, %v1048_v25  ;;  %v1130_v41 = vsub.f32 1.0, %v1126_v28  ;;  %1434 = vmatpush1.bf16.msra.mxu1 %v3034_v11  ;;  %v3037_v25 = vld [vmem:[%s3895_s3 + $0xc8] ss:$20 sps:$4 sm:$0xff]   ;;  %v3043_v28 = vld [vmem:[%s3895_s3 + $0x118] ss:$20 sps:$4 sm:$0xff]  }
 0xbbe   :  { %v1133_v40 = vmul.f32 %v1129_v35, %v1049_v39  ;;  %v1131_v44 = vsub.f32 1.0, %v1127_v59  ;;  %1435 = vmatprep.subr.bf16.mxu1 %v3039_v13  ;;  %v3042_v35 = vld [vmem:[%s3895_s3 + $0xf4] ss:$20 sps:$4 sm:$0xff]  }
 0xbbf   :  { %v1136_v42 = vadd.f32 1.0, %v1132_v36  ;;  %v1134_v43 = vmul.f32 %v1130_v41, %v1050_v10  ;;  %v3040_v36 = vld [vmem:[%s3895_s3 + $0xf0] ss:$20 sps:$4 sm:$0xff]  }
 0xbc0   :  { %v1137_v61 = vadd.f32 1.0, %v1133_v40  ;;  %v1135_v51 = vmul.f32 %v1131_v44, %v1051_v47  ;;  %v2617_v44 = vld [vmem:[%s3897_s5 + $0x10] ss:$0 sm:$0xff] }
 0xbc1   :  { %v1138_v49 = vadd.f32 1.0, %v1134_v43  ;;  %v1140_v53 = vmul.f32 %v1136_v42, %v1036_v45  ;;  %1436 = vmatpush1.bf16.msra.mxu1 %v3037_v25 }
 0xbc2   :  { %v1139_v56 = vadd.f32 1.0, %v1135_v51  ;;  %v1141_v21 = vmul.f32 %v1137_v61, %v1037_v52  ;;  %1437 = vmatprep.subr.bf16.mxu1 %v3042_v35 }
 0xbc3   :  { %v1142_v18 = vmul.f32 %v1138_v49, %v1038_v38  ;;  %v2618_v38 = vld [vmem:[%s3897_s5 + $0x11] ss:$0 sm:$0xff] }
 0xbc4   :  { %v1143_v2 = vmul.f32 %v1139_v56, %v1039_v7 }
 0xbc5   :  { %v1144_v60 = vpack.c.bf16 %v1142_v18, %v1140_v53  ;;  %1438 = vmatpush1.bf16.msra.mxu1 %v3040_v36  ;;  %v2619_v18 = vld [vmem:[%s3897_s5 + $0x12] ss:$8 sm:$0x3] }
 0xbc6   :  { %v1145_v3 = vpack.c.bf16 %v1143_v2, %v1141_v21  ;;  %1439 = vmatprep.subr.bf16.mxu1 %v3045_v37  ;;  %v1383_v7 = vrot.slane %v2619_v18, %v3349_v62  ;;  %v1387_v21 = vrot.slane %v2619_v18, %v3354_v0 }
 0xbc8   :  { %1274 = vmatprep.mubr.bf16.mxu0 %v1145_v3 }
 0xbc9   :  { %1275 = vmatmul.mubr.bf16.vlgmr.msra.gmra.mrb[8].mxu0 %v1144_v60  ;;  %1440 = vmatpush1.bf16.msra.mxu1 %v3043_v28 }
 0xc9c   :  { %v2733_v54 = vpop.f32.mrb[8].mxu0 }
 0xc9d   :  { %v2734_v4 = vpop.f32.mrb[9].mxu0 }
 0xc9e   :  { %v2735_v5 = vadd.f32 %v2734_v4, %v2733_v54  ;;  %v2736_v6 = vpop.f32.mrb[10].mxu0 }
 0xc9f   :  { %v2737_v55 = vpop.f32.mrb[11].mxu0 }
 0xca0   :  { %v1283_v8 = vadd.f32 %v2735_v5, %v3451_v48  ;;  %v2738_v9 = vadd.f32 %v2737_v55, %v2736_v6 }
 0xca2   :  { %v3589_v63 = vadd.f32 %v1283_v8, %v242_v58  ;;  %v1284_v12 = vadd.f32 %v2738_v9, %v3454_v50 }
 0xca4   :  { %v3592_v14 = vadd.f32 %v1284_v12, %v242_v58  ;;  %v1348_v15 = vsel %vm140_vm0, %v3589_v63, 0.0 }
 0xca5   :  { %1349 = vadd.xlane.f32.xlu1 %v1348_v15 }
 0xca6   :  { %v1351_v16 = vsel %vm246_vm1, %v3592_v14, 0.0 }
 0xca9   :  { %1352 = vadd.xlane.f32.xlu1 %v1351_v16 }
 0xd32   :  { %v1350_v17 = vpop.xlane.xlu1 %1349 }
 0xd33   :  { %v1354_v20 = vmul.f32 0.015625, %v1350_v17 }
 0xd35   :  { %v1356_v26 = vsub.f32 %v3589_v63, %v1354_v20 }
 0xd36   :  { %v1353_v48 = vpop.xlane.xlu1 %1352 }
 0xd37   :  { %v1355_v27 = vmul.f32 0.015625, %v1353_v48  ;;  %v1358_v29 = vmul.f32 %v1356_v26, %v1356_v26 }
 0xd39   :  { %v1357_v30 = vsub.f32 %v3592_v14, %v1355_v27  ;;  %v1360_v50 = vsel %vm140_vm0, %v1358_v29, 0.0 }
 0xd3a   :  { %1361 = vadd.xlane.f32.xlu0 %v1360_v50 }
 0xd3b   :  { %v1359_v31 = vmul.f32 %v1357_v30, %v1357_v30 }
 0xd3d   :  { %v1363_v32 = vsel %vm246_vm1, %v1359_v31, 0.0 }
 0xd3e   :  { %1364 = vadd.xlane.f32.xlu1 %v1363_v32 }
 0xdc7   :  { %v1362_v57 = vpop.xlane.xlu0 %1361 }
 0xdc8   :  { %v1366_v39 = vmul.f32 0.015625, %v1362_v57 }
 0xdca   :  { %v1368_v40 = vadd.f32 1e-06, %v1366_v39 }
 0xdcb   :  { %v1365_v41 = vpop.xlane.xlu1 %1364 }
 0xdcc   :  { %3122 = vrsqrt.f32 %v1368_v40  ;;  %v1367_v59 = vmul.f32 0.015625, %v1365_v41 }
 0xdce   :  { %v1369_v10 = vadd.f32 1e-06, %v1367_v59 }
 0xdd0   :  { %3124 = vrsqrt.f32 %v1369_v10 }
 0xdd6   :  { %v3123_v42 = vpop.eup %3122 }
 0xdd7   :  { %v1372_v43 = vmul.f32 %v3123_v42, %v1356_v26 }
 0xdd9   :  { %v1374_v47 = vmul.f32 %v2617_v44, %v1372_v43 }
 0xdda   :  { %v3125_v45 = vpop.eup %3124 }
 0xddb   :  { %v1373_v61 = vmul.f32 %v3125_v45, %v1357_v30  ;;  %v1376_v51 = vadd.f32 %v2618_v38, %v1374_v47 }
 0xddd   :  { %v1375_v49 = vmul.f32 %v2617_v44, %v1373_v61 }
 0xddf   :  { %v1377_v52 = vadd.f32 %v2618_v38, %v1375_v49 }
 0xde1   :  { %v1378_v53 = vpack.c.bf16 %v1377_v52, %v1376_v51 }
 0xde3   :  { %2633 = vmatmul.mubr.msk.bf16.vlgmr.msra.gmra.mrb[20].mxu1 %vm140_vm0, %v1378_v53 }
 0xeb6   :  { %v1467_v56 = vpop.f32.mrb[20].mxu1 }
 0xeb7   :  { %v1468_v60 = vadd.f32 %v1467_v56, %v1383_v7  ;;  %v1469_v2 = vpop.f32.mrb[21].mxu1 }
 0xeb8   :  { %v1471_v3 = vpop.f32.mrb[22].mxu1  ;;  %v3639_v5 = vadd.f32 %v1469_v2, %v1387_v21 }
 0xeb9   :  { %v1472_v54 = vadd.f32 %v1471_v3, %v1383_v7  ;;  %v1473_v4 = vpop.f32.mrb[23].mxu1  ;;  %2836 = vmatprep.mubr.msk.f32.mxu1 %vm387_vm2, %v1468_v60 }
 0xeba   :  { %v3641_v6 = vadd.f32 %v1473_v4, %v1387_v21 }
 0xebb   :  { %1678 = vrot.lane.b32.xlu0 %v1472_v54, %s3192_s14  ;;  %v2960_v58 = vpack.i.bf16 %v1472_v54, %v1468_v60 }
 0xebc   :  { %v2970_v55 = vpack.i.bf16 %v3641_v6, %v3639_v5  ;;  %v2918_v8 = vpack.c.bf16 %v3641_v6, %v3639_v5 }
 0xebd   :  { %2961 = vrot.lane.b32.xlu1 %v2960_v58, %s3189_s10  ;;  %s3196_s10 = smov [#allocation2]  }
 0xec1   :  { %2966 = vrot.lane.b32.xlu1 %v2960_v58, %s3191_s13  ;;  %s2488_s13 = sshll.u32 %s3196_s10, 4  ;;  %s2489_s13 = int_to_ptr.vmem [resolvable:$true] %s2488_s13 }
 0xec2   :  { %p3169_p1 = scmp.lt.s32.totalorder %s2489_s13, %s2489_s13 }
 0xec5   :  { %1676 = vrot.lane.b32.xlu1 %v1468_v60, %s3192_s14 }
 0xf2d   :  { %v1679_v29 = vpop.permute.xlu0 %1678 }
 0xf2f   :  { %v2962_v9 = vpop.permute.xlu1 %2961 }
 0xf30   :  { %v2964_v12 = vunpack.i.h.bf16 %v2962_v9  ;;  %v2963_v15 = vunpack.i.l.bf16 %v2962_v9 }
 0xf32   :  { %v2912_v16 = vpack.c.bf16 %v2964_v12, %v2963_v15  ;;  %v3046_v12 = vld [vmem:[%s3895_s3 + $0xa8] ss:$20 sps:$4 sm:$0xff]  }
 0xf33   :  { %v2967_v17 = vpop.permute.xlu1 %2966 }
 0xf34   :  { %v2969_v20 = vunpack.i.h.bf16 %v2967_v17  ;;  %v2968_v26 = vunpack.i.l.bf16 %v2967_v17  ;;  %2914 = vmatprep.subr.msk.bf16.mxu1 %vm3370_vm4, %v2912_v16  ;;  %v3049_v17 = vld [vmem:[%s3895_s3 + $0x120] ss:$20 sps:$4 sm:$0xff]  }
 0xf35   :  { %2917 = vmatpush3.bf16.xpose.msk.msra.mxu1 %vm3370_vm4, %v2912_v16  ;;  %v3048_v16 = vld [vmem:[%s3895_s3 + $0xd0] ss:$20 sps:$4 sm:$0xff]  }
 0xf36   :  { %v2924_v48 = vpack.c.bf16 %v2969_v20, %v2968_v26  ;;  %2920 = vmatprep.subr.msk.bf16.mxu1 %vm3374_vm6, %v2918_v8 }
 0xf37   :  { %v1677_v27 = vpop.permute.xlu1 %1676 }
 0xf38   :  { %2926 = vmatprep.subr.msk.bf16.mxu0 %vm3370_vm4, %v2924_v48  ;;  %2850 = vmatprep.mubr.msk.f32.mxu0 %vm387_vm2, %v1677_v27 }
 0xf39   :  { %2929 = vmatpush3.bf16.xpose.msk.msra.mxu0 %vm3370_vm4, %v2924_v48 }
 0xf3a   :  { %2860 = vmatprep.subr.bf16.mxu0 %v3193_v46 }
 0xf3c   :  { %2837 = vmatmul.mubr.msk.f32.vlgmr.msra.gmra.mrb[24].mxu1 %vm387_vm2, %v1472_v54 }
 0xf3d   :  { %2923 = vmatpush3.bf16.msk.msra.mxu1 %vm3374_vm6, %v2918_v8 }
 0xf40   :  { %2851 = vmatmul.mubr.msk.f32.vlgmr.msra.gmra.mrb[12].mxu0 %vm387_vm2, %v1679_v29 }
 0xf41   :  { %2864 = vmatprep.mubr.msk.bf16.mxu0 %vm3194_vm9, %v3193_v46  ;;  %2861 = vmatpush3.bf16.msra.mxu0 %v3047_v22 }
 0xf42   :  { %2862 = vmatprep.subr.bf16.mxu0 %v3193_v46 }
 0xf45   :  { %2863 = vmatpush3.bf16.msra.mxu0 %v3049_v17  ;;  %v3063_v17 = vld [vmem:[%s3896_s4 + $0x80] sm:$0xff]  }
0x100f   :  { %v2838_v30 = vpop.f32.mrb[24].mxu1 }
0x1010   :  { %v1562_v50 = vadd.f32 %v2838_v30, %v3389_v24  ;;  %v1556_v31 = vpop.f32.mrb[25].mxu1 }
0x1011   :  { %v1557_v19 = vadd.f32 %v1556_v31, %v3387_v23 }
0x1012   :  { %v1568_v32 = vsel %vm475_vm7, %v1562_v50, -inf }
0x1013   :  { %v2852_v33 = vpop.f32.mrb[12].mxu0  ;;  %1569 = vmax.xlane.f32.xlu0 %v1568_v32  ;;  %v1565_v11 = vsel %vm471_vm8, %v1557_v19, -inf }
0x1014   :  { %v1758_v13 = vpop.f32.mrb[13].mxu0  ;;  %1566 = vmax.xlane.f32.xlu1 %v1565_v11  ;;  %v1764_v35 = vadd.f32 %v2852_v33, %v3389_v24 }
0x1015   :  { %v1759_v25 = vadd.f32 %v1758_v13, %v3387_v23 }
0x1016   :  { %v1770_v28 = vsel %vm475_vm7, %v1764_v35, -inf }
0x1017   :  { %v1767_v36 = vsel %vm471_vm8, %v1759_v25, -inf }
0x1018   :  { %1768 = vmax.xlane.f32.xlu1 %v1767_v36 }
0x101c   :  { %1771 = vmax.xlane.f32.xlu1 %v1770_v28 }
0x10a0   :  { %v1570_v37 = vpop.xlane.xlu0 %1569 }
0x10a1   :  { %v1572_v57 = vsub.f32 %v1562_v50, %v1570_v37  ;;  %v1567_v39 = vpop.xlane.xlu1 %1566 }
0x10a2   :  { %v1571_v40 = vsub.f32 %v1557_v19, %v1567_v39 }
0x10a3   :  { %v1575_v41 = vmul.f32 1.442695, %v1572_v57 }
0x10a4   :  { %v1573_v59 = vmul.f32 1.442695, %v1571_v40 }
0x10a5   :  { %3126 = vpow2.f32 %v1575_v41  ;;  %v1769_v10 = vpop.xlane.xlu1 %1768 }
0x10a6   :  { %v1773_v42 = vsub.f32 %v1759_v25, %v1769_v10  ;;  %3128 = vpow2.f32 %v1573_v59  ;;  %v2620_v25 = vld [vmem:[%s3897_s5 + $0x13] ss:$0 sm:$0xff] }
0x10a8   :  { %v1775_v43 = vmul.f32 1.442695, %v1773_v42 }
0x10a9   :  { %v1772_v23 = vpop.xlane.xlu1 %1771 }
0x10aa   :  { %v1774_v44 = vsub.f32 %v1764_v35, %v1772_v23  ;;  %3130 = vpow2.f32 %v1775_v43 }
0x10ac   :  { %v1777_v24 = vmul.f32 1.442695, %v1774_v44 }
0x10ae   :  { %3132 = vpow2.f32 %v1777_v24 }
0x10af   :  { %v3127_v45 = vpop.eup %3126 }
0x10b0   :  { %v1580_v47 = vsel %vm475_vm7, %v3127_v45, 0.0  ;;  %v3129_v61 = vpop.eup %3128 }
0x10b1   :  { %1581 = vadd.xlane.f32.xlu1 %v1580_v47  ;;  %v1577_v38 = vsel %vm471_vm8, %v3129_v61, 0.0  ;;  %v3052_v47 = vld [vmem:[%s3895_s3 + $0xb0] ss:$20 sps:$4 sm:$0xff]  }
0x10b2   :  { %2084 = vmatprep.subr.bf16.mxu0 %v3052_v47 }
0x10b4   :  { %v3131_v49 = vpop.eup %3130 }
0x10b5   :  { %1578 = vadd.xlane.f32.xlu1 %v1577_v38  ;;  %v1779_v52 = vsel %vm471_vm8, %v3131_v49, 0.0  ;;  %v3055_v38 = vld [vmem:[%s3895_s3 + $0xd8] ss:$20 sps:$4 sm:$0xff]  }
0x10b8   :  { %v3133_v51 = vpop.eup %3132 }
0x10b9   :  { %1780 = vadd.xlane.f32.xlu1 %v1779_v52  ;;  %v1782_v53 = vsel %vm475_vm7, %v3133_v51, 0.0  ;;  %v3056_v52 = vld [vmem:[%s3895_s3 + $0xfc] ss:$20 sps:$4 sm:$0xff]  }
0x10ba   :  { %1783 = vadd.xlane.f32.xlu0 %v1782_v53  ;;  %v3059_v53 = vld [vmem:[%s3895_s3 + $0x124] ss:$20 sps:$4 sm:$0xff]  }
0x10ca   :  { %2971 = vrot.lane.b32.xlu1 %v2970_v55, %s3192_s14  ;;  %s3164_s14 = scalar_lea.vmem %s2489_s13, 32 }
0x10cb   :  { %p3165_p0 = scmp.ne.s32.totalorder %s2489_s13, %s3164_s14  ;;  %p3170_p2 = scmp.lt.s32.totalorder %s3164_s14, %s3164_s14 }
0x10cd   :  { %p3171_p3 = por %p3170_p2, %p3169_p1 }
0x10cf   :  { %p3172_p4 = pnand %p3171_p3, %p3165_p0 }
0x113e   :  { %v1582_v18 = vpop.xlane.xlu1 %1581 }
0x113f   :  { %3134 = vrcp.f32 %v1582_v18  ;;  %v3061_v18 = vld [vmem:[%s3895_s3 + $0x128] ss:$20 sps:$4 sm:$0xff]  }
0x1142   :  { %v1579_v7 = vpop.xlane.xlu1 %1578 }
0x1143   :  { %3136 = vrcp.f32 %v1579_v7 }
0x1146   :  { %v1781_v56 = vpop.xlane.xlu1 %1780 }
0x1147   :  { %3138 = vrcp.f32 %v1781_v56  ;;  %v1784_v21 = vpop.xlane.xlu0 %1783 }
0x1148   :  { %3140 = vrcp.f32 %v1784_v21 }
0x1149   :  { %v3135_v54 = vpop.eup %3134 }
0x114a   :  { %v2972_v60 = vpop.permute.xlu1 %2971  ;;  %v1586_v9 = vmul.f32 %v3135_v54, %v3127_v45 }
0x114b   :  { %v2974_v2 = vunpack.i.h.bf16 %v2972_v60  ;;  %v2973_v3 = vunpack.i.l.bf16 %v2972_v60 }
0x114d   :  { %v3137_v4 = vpop.eup %3136  ;;  %v2930_v58 = vpack.c.bf16 %v2974_v2, %v2973_v3 }
0x114e   :  { %v1585_v8 = vmul.f32 %v3137_v4, %v3129_v61  ;;  %v3050_v61 = vld [vmem:[%s3895_s3 + $0xac] ss:$20 sps:$4 sm:$0xff]  }
0x114f   :  { %2932 = vmatprep.subr.msk.bf16.mxu1 %vm3374_vm6, %v2930_v58 }
0x1150   :  { %2843 = vmatprep.mubr.msk.f32.mxu1 %vm471_vm8, %v1585_v8 }
0x1151   :  { %v3139_v5 = vpop.eup %3138  ;;  %2844 = vmatmul.mubr.msk.f32.vlgmr.msra.gmra.mrb[26].mxu1 %vm471_vm8, %v1586_v9 }
0x1152   :  { %v3141_v6 = vpop.eup %3140  ;;  %2935 = vmatpush3.bf16.msk.msra.mxu1 %vm3374_vm6, %v2930_v58  ;;  %v1787_v55 = vmul.f32 %v3139_v5, %v3131_v49  ;;  %v3053_v49 = vld [vmem:[%s3895_s3 + $0xd4] ss:$20 sps:$4 sm:$0xff]  }
0x1153   :  { %v1788_v15 = vmul.f32 %v3141_v6, %v3133_v51  ;;  %2868 = vmatprep.subr.bf16.mxu1 %v3193_v46  ;;  %v3058_v51 = vld [vmem:[%s3895_s3 + $0x100] ss:$20 sps:$4 sm:$0xff]  }
0x1154   :  { %2857 = vmatprep.mubr.msk.f32.mxu1 %vm471_vm8, %v1787_v55  ;;  %v2621_v58 = vld [vmem:[%s3897_s5 + $0x14] ss:$0 sm:$0xff]  ;;  %v2622_v6 = vld [vmem:[%s3897_s5 + $0x15] ss:$0 sm:$0xff] }
0x1155   :  { %2858 = vmatmul.mubr.msk.f32.vlgmr.msra.gmra.mrb[28].mxu1 %vm471_vm8, %v1788_v15 }
0x1156   :  { %2869 = vmatpush3.bf16.msra.mxu1 %v3046_v12  ;;  %2872 = vmatprep.mubr.msk.bf16.mxu1 %vm3194_vm9, %v3193_v46 }
0x1157   :  { %2870 = vmatprep.subr.bf16.mxu1 %v3193_v46 }
0x115a   :  { %2871 = vmatpush3.bf16.msra.mxu1 %v3048_v16  ;;  %v3062_v16 = vld [vmem:[%s3896_s4 + $0xc0] sm:$0xff]  }
0x115b   :  { %2761 = vmatprep.subr.bf16.mxu1 %v3062_v16 }
0x1224   :  { %v2845_v20 = vpop.f32.mrb[26].mxu1 }
0x1225   :  { %v1662_v26 = vpop.f32.mrb[27].mxu1 }
0x1226   :  { %v1675_v48 = vpack.c.bf16 %v2845_v20, %v1662_v26  ;;  %v3064_v20 = vld [vmem:[%s3896_s4 + $0xc8] sm:$0xff]  }
0x1227   :  { %v3065_v26 = vld [vmem:[%s3896_s4 + $0x88] sm:$0xff]  }
0x1228   :  { %v2859_v27 = vpop.f32.mrb[28].mxu1  ;;  %2873 = vmatmul.mubr.msk.bf16.vlgmr.msra.gmra.mrb[32].mxu1 %vm387_vm2, %v1675_v48  ;;  %v3066_v48 = vld [vmem:[%s3896_s4 + $0xd0] sm:$0xff]  }
0x1229   :  { %v1869_v29 = vpop.f32.mrb[29].mxu1  ;;  %2762 = vmatpush3.bf16.msra.mxu1 %v3063_v17 }
0x122a   :  { %v1882_v30 = vpack.c.bf16 %v2859_v27, %v1869_v29  ;;  %2763 = vmatprep.subr.bf16.mxu1 %v3064_v20  ;;  %v3067_v27 = vld [vmem:[%s3896_s4 + $0x90] sm:$0xff]   ;;  %v3068_v29 = vld [vmem:[%s3896_s4 + $0xd8] sm:$0xff]  }
0x122c   :  { %2865 = vmatmul.mubr.msk.bf16.vlgmr.msra.gmra.mrb[16].mxu0 %vm387_vm2, %v1882_v30  ;;  %v3069_v30 = vld [vmem:[%s3896_s4 + $0x98] sm:$0xff]  }
0x122d   :  { %2116 = vmatprep.mubr.bf16.mxu0 %v3188_v1  ;;  %2085 = vmatpush1.bf16.msra.mxu0 %v3050_v61 }
0x122e   :  { %2086 = vmatprep.subr.bf16.mxu0 %v3055_v38  ;;  %2764 = vmatpush3.bf16.msra.mxu1 %v3065_v26 }
0x122f   :  { %2765 = vmatprep.subr.bf16.mxu1 %v3066_v48 }
0x1231   :  { %2087 = vmatpush1.bf16.msra.mxu0 %v3053_v49 }
0x1232   :  { %2088 = vmatprep.subr.bf16.mxu0 %v3058_v51  ;;  %2766 = vmatpush3.bf16.msra.mxu1 %v3067_v27 }
0x1233   :  { %2767 = vmatprep.subr.bf16.mxu1 %v3068_v29 }
0x1235   :  { %2089 = vmatpush1.bf16.msra.mxu0 %v3056_v52 }
0x1236   :  { %2090 = vmatprep.subr.bf16.mxu0 %v3061_v18  ;;  %2768 = vmatpush3.bf16.msra.mxu1 %v3069_v30 }
0x1239   :  { %2091 = vmatpush1.bf16.msra.mxu0 %v3059_v53 }
0x123a   :  { %2876 = vmatprep.subr.bf16.mxu0 %v3193_v46 }
0x12fb   :  { %v1988_v50 = vpop.f32.mrb[32].mxu1 }
0x12fc   :  { %v2874_v31 = vpop.f32.mrb[33].mxu1 }
0x12fd   :  { %v1991_v19 = vpop.f32.mrb[34].mxu1  ;;  %v3071_v31 = vld [vmem:[%s3896_s4 + $0xa0] sm:$0xff]  }
0x12fe   :  { %v2875_v32 = vpop.f32.mrb[35].mxu1 }
0x12ff   :  { %v1932_v33 = vpop.f32.mrb[16].mxu0  ;;  %v3073_v32 = vld [vmem:[%s3896_s4 + $0xa8] sm:$0xff]  }
0x1300   :  { %v1989_v11 = vadd.f32 %v1988_v50, %v1932_v33  ;;  %v2866_v13 = vpop.f32.mrb[17].mxu0  ;;  %v3070_v50 = vld [vmem:[%s3896_s4 + $0xe0] sm:$0xff]   ;;  %v3074_v33 = vld [vmem:[%s3896_s4 + $0xf0] sm:$0xff]  }
0x1301   :  { %v1935_v35 = vpop.f32.mrb[18].mxu0  ;;  %2769 = vmatprep.subr.bf16.mxu1 %v3070_v50  ;;  %v3076_v13 = vld [vmem:[%s3896_s4 + $0xf8] sm:$0xff]  }
0x1302   :  { %v1995_v36 = vadd.f32 %v1989_v11, %v3589_v63  ;;  %v1992_v28 = vadd.f32 %v1991_v19, %v1935_v35  ;;  %v2867_v37 = vpop.f32.mrb[19].mxu0  ;;  %2770 = vmatpush3.bf16.msra.mxu1 %v3071_v31  ;;  %v3072_v19 = vld [vmem:[%s3896_s4 + $0xe8] sm:$0xff]   ;;  %v3075_v11 = vld [vmem:[%s3896_s4 + $0xb0] sm:$0xff]  }
0x1303   :  { %2771 = vmatprep.subr.bf16.mxu1 %v3072_v19  ;;  %v2623_v35 = vld [vmem:[%s3897_s5 + $0x16] ss:$8 sm:$0x3] }
0x1304   :  { %v3717_v57 = vadd.f32 %v2620_v25, %v1995_v36  ;;  %v1996_v1 = vadd.f32 %v1992_v28, %v3592_v14  ;;  %v2034_v36 = vrot.slane %v2623_v35, %v3349_v62  ;;  %v2038_v28 = vrot.slane %v2623_v35, %v3354_v0 }
0x1306   :  { %v1999_v39 = vsel %vm140_vm0, %v3717_v57, 0.0  ;;  %v1998_v40 = vadd.f32 %v2620_v25, %v1996_v1  ;;  %2772 = vmatpush3.bf16.msra.mxu1 %v3073_v32  ;;  %v3077_v25 = vld [vmem:[%s3896_s4 + $0xb8] sm:$0xff]  }
0x1307   :  { %2000 = vadd.xlane.f32.xlu0 %v1999_v39  ;;  %2773 = vmatprep.subr.bf16.mxu1 %v3074_v33 }
0x1308   :  { %v2002_v41 = vsel %vm246_vm1, %v1998_v40, 0.0 }
0x130a   :  { %2774 = vmatpush3.bf16.msra.mxu1 %v3075_v11 }
0x130b   :  { %2003 = vadd.xlane.f32.xlu0 %v2002_v41  ;;  %2775 = vmatprep.subr.bf16.mxu1 %v3076_v13 }
0x130e   :  { %2776 = vmatpush3.bf16.msra.mxu1 %v3077_v25 }
0x1394   :  { %v2001_v59 = vpop.xlane.xlu0 %2000 }
0x1395   :  { %v2005_v10 = vmul.f32 0.015625, %v2001_v59 }
0x1397   :  { %v2007_v42 = vsub.f32 %v3717_v57, %v2005_v10 }
0x1398   :  { %v2004_v43 = vpop.xlane.xlu0 %2003 }
0x1399   :  { %v2006_v63 = vmul.f32 0.015625, %v2004_v43  ;;  %v2009_v23 = vmul.f32 %v2007_v42, %v2007_v42 }
0x139b   :  { %v2008_v44 = vsub.f32 %v1998_v40, %v2006_v63  ;;  %v2011_v24 = vsel %vm140_vm0, %v2009_v23, 0.0 }
0x139c   :  { %2012 = vadd.xlane.f32.xlu0 %v2011_v24 }
0x139d   :  { %v2010_v14 = vmul.f32 %v2008_v44, %v2008_v44 }
0x139f   :  { %v2014_v45 = vsel %vm246_vm1, %v2010_v14, 0.0 }
0x13a0   :  { %2015 = vadd.xlane.f32.xlu0 %v2014_v45 }
0x1429   :  { %v2013_v7 = vpop.xlane.xlu0 %2012 }
0x142a   :  { %v2017_v56 = vmul.f32 0.015625, %v2013_v7 }
0x142c   :  { %v2019_v21 = vadd.f32 1e-06, %v2017_v56 }
0x142d   :  { %v2016_v60 = vpop.xlane.xlu0 %2015 }
0x142e   :  { %3142 = vrsqrt.f32 %v2019_v21  ;;  %v2018_v2 = vmul.f32 0.015625, %v2016_v60 }
0x1430   :  { %v2020_v3 = vadd.f32 1e-06, %v2018_v2 }
0x1432   :  { %3144 = vrsqrt.f32 %v2020_v3 }
0x1438   :  { %v3143_v54 = vpop.eup %3142 }
0x1439   :  { %v2023_v4 = vmul.f32 %v3143_v54, %v2007_v42 }
0x143b   :  { %v2025_v9 = vmul.f32 %v2621_v58, %v2023_v4 }
0x143c   :  { %v3145_v8 = vpop.eup %3144 }
0x143d   :  { %v2024_v5 = vmul.f32 %v3145_v8, %v2008_v44  ;;  %v2027_v12 = vadd.f32 %v2622_v6, %v2025_v9 }
0x143f   :  { %v2026_v55 = vmul.f32 %v2621_v58, %v2024_v5 }
0x1441   :  { %v2028_v15 = vadd.f32 %v2622_v6, %v2026_v55 }
0x1443   :  { %v2029_v22 = vpack.c.bf16 %v2028_v15, %v2027_v12 }
0x1445   :  { %2670 = vmatmul.mubr.msk.bf16.vlgmr.msra.gmra.mrb[20].mxu0 %vm140_vm0, %v2029_v22 }
0x1446   :  { %2884 = vmatprep.mubr.msk.bf16.mxu0 %vm3194_vm9, %v3193_v46 }
0x1518   :  { %v2118_v37 = vpop.f32.mrb[20].mxu0 }
0x1519   :  { %v3813_v1 = vadd.f32 %v2118_v37, %v2034_v36  ;;  %v2120_v39 = vpop.f32.mrb[21].mxu0 }
0x151a   :  { %v3815_v40 = vadd.f32 %v2120_v39, %v2038_v28  ;;  %v2122_v41 = vpop.f32.mrb[22].mxu0 }
0x151b   :  { %v3818_v59 = vmul.f32 0.70710677, %v3813_v1  ;;  %v3820_v10 = vadd.f32 %v2122_v41, %v2034_v36  ;;  %v2124_v42 = vpop.f32.mrb[23].mxu0 }
0x151c   :  { %v3823_v43 = vmul.f32 0.70710677, %v3815_v40  ;;  %v3829_v63 = vadd.f32 %v2124_v42, %v2038_v28 }
0x151d   :  { %v2143_v62 = vand.u32 2147483647, %v3818_v59  ;;  %v3827_v0 = vmul.f32 0.70710677, %v3820_v10  ;;  %vm2135_vm14 = vcmp.ge.f32.partialorder %v3818_v59, 0.0 }
0x151e   :  { %v2144_v23 = vand.u32 2147483647, %v3823_v43  ;;  %v3834_v47 = vmul.f32 0.70710677, %v3829_v63  ;;  %vm2136_vm15 = vcmp.ge.f32.partialorder %v3823_v43, 0.0 }
0x151f   :  { %v2147_v44 = vmul.f32 0.3275911, %v2143_v62  ;;  %v2145_v14 = vand.u32 2147483647, %v3827_v0  ;;  %v2199_v18 = vsub.f32 0.0, %v2143_v62  ;;  %vm2137_vm2 = vcmp.ge.f32.partialorder %v3827_v0, 0.0 }
0x1520   :  { %v2148_v24 = vmul.f32 0.3275911, %v2144_v23  ;;  %v2146_v49 = vand.u32 2147483647, %v3834_v47  ;;  %v2200_v7 = vsub.f32 0.0, %v2144_v23  ;;  %v2140_v59 = vsel %vm2136_vm15, 1.0, %v3195_v34 }
0x1521   :  { %v2151_v45 = vadd.f32 1.0, %v2147_v44  ;;  %v2149_v38 = vmul.f32 0.3275911, %v2145_v14  ;;  %v2203_v21 = vmul.f32 %v2199_v18, %v2143_v62  ;;  %v2201_v60 = vsub.f32 0.0, %v2145_v14 }
0x1522   :  { %v2152_v61 = vadd.f32 1.0, %v2148_v24  ;;  %v2150_v52 = vmul.f32 0.3275911, %v2146_v49  ;;  %v2204_v54 = vmul.f32 %v2200_v7, %v2144_v23  ;;  %v2202_v58 = vsub.f32 0.0, %v2146_v49 }
0x1523   :  { %3146 = vrcp.f32 %v2151_v45  ;;  %v2153_v51 = vadd.f32 1.0, %v2149_v38  ;;  %v2207_v5 = vmul.f32 1.442695, %v2203_v21  ;;  %v2205_v55 = vmul.f32 %v2201_v60, %v2145_v14 }
0x1524   :  { %3148 = vrcp.f32 %v2152_v61  ;;  %v2154_v53 = vadd.f32 1.0, %v2150_v52  ;;  %v2209_v15 = vmul.f32 1.442695, %v2204_v54  ;;  %v2206_v20 = vmul.f32 %v2202_v58, %v2146_v49 }
0x1525   :  { %3150 = vrcp.f32 %v2153_v51  ;;  %v2211_v30 = vmul.f32 1.442695, %v2205_v55  ;;  %vm2138_vm3 = vcmp.ge.f32.partialorder %v3834_v47, 0.0  ;;  %v2141_v43 = vsel %vm2137_vm2, 1.0, %v3195_v34 }
0x1526   :  { %3152 = vrcp.f32 %v2154_v53  ;;  %v2213_v33 = vmul.f32 1.442695, %v2206_v20  ;;  %v2130_v47 = vmul.f32 0.5, %v3829_v63 }
0x1527   :  { %3154 = vpow2.f32 %v2207_v5 }
0x1528   :  { %3156 = vpow2.f32 %v2209_v15  ;;  %v2127_v15 = vmul.f32 0.5, %v3813_v1 }
0x1529   :  { %3158 = vpow2.f32 %v2211_v30 }
0x152a   :  { %3160 = vpow2.f32 %v2213_v33 }
0x152d   :  { %v3147_v56 = vpop.eup %3146 }
0x152e   :  { %v3149_v2 = vpop.eup %3148  ;;  %v2163_v3 = vmul.f32 1.0614054, %v3147_v56 }
0x152f   :  { %v2164_v4 = vmul.f32 1.0614054, %v3149_v2  ;;  %v3151_v9 = vpop.eup %3150 }
0x1530   :  { %v2167_v8 = vadd.f32 -1.4531521, %v2163_v3  ;;  %v2165_v22 = vmul.f32 1.0614054, %v3151_v9  ;;  %v3153_v16 = vpop.eup %3152  ;;  %v2139_v3 = vsel %vm2135_vm14, 1.0, %v3195_v34 }
0x1531   :  { %v2168_v6 = vadd.f32 -1.4531521, %v2164_v4  ;;  %v2166_v27 = vmul.f32 1.0614054, %v3153_v16  ;;  %v3155_v45 = vpop.eup %3154 }
0x1532   :  { %v2171_v12 = vmul.f32 %v3147_v56, %v2167_v8  ;;  %v2169_v48 = vadd.f32 -1.4531521, %v2165_v22  ;;  %v3157_v38 = vpop.eup %3156  ;;  %v2142_v22 = vsel %vm2138_vm3, 1.0, %v3195_v34 }
0x1533   :  { %v2172_v17 = vmul.f32 %v3149_v2, %v2168_v6  ;;  %v2170_v19 = vadd.f32 -1.4531521, %v2166_v27  ;;  %v3159_v60 = vpop.eup %3158 }
0x1534   :  { %v2175_v26 = vadd.f32 1.4214138, %v2171_v12  ;;  %v2173_v31 = vmul.f32 %v3151_v9, %v2169_v48  ;;  %v3161_v58 = vpop.eup %3160 }
0x1535   :  { %v2176_v29 = vadd.f32 1.4214138, %v2172_v17  ;;  %v2174_v25 = vmul.f32 %v3153_v16, %v2170_v19 }
0x1536   :  { %v2179_v50 = vmul.f32 %v3147_v56, %v2175_v26  ;;  %v2177_v13 = vadd.f32 1.4214138, %v2173_v31  ;;  %v2128_v26 = vmul.f32 0.5, %v3815_v40  ;;  %v2624_v40 = vld [vmem:[%s3897_s5 + $0x17] ss:$0 sm:$0xff] }
0x1537   :  { %v2180_v32 = vmul.f32 %v3149_v2, %v2176_v29  ;;  %v2178_v37 = vadd.f32 1.4214138, %v2174_v25 }
0x1538   :  { %v2183_v11 = vadd.f32 -0.28449672, %v2179_v50  ;;  %v2181_v28 = vmul.f32 %v3151_v9, %v2177_v13 }
0x1539   :  { %v2184_v35 = vadd.f32 -0.28449672, %v2180_v32  ;;  %v2182_v62 = vmul.f32 %v3153_v16, %v2178_v37 }
0x153a   :  { %v2187_v36 = vmul.f32 %v3147_v56, %v2183_v11  ;;  %v2185_v42 = vadd.f32 -0.28449672, %v2181_v28 }
0x153b   :  { %v2188_v39 = vmul.f32 %v3149_v2, %v2184_v35  ;;  %v2186_v14 = vadd.f32 -0.28449672, %v2182_v62 }
0x153c   :  { %v2191_v41 = vadd.f32 0.2548296, %v2187_v36  ;;  %v2189_v24 = vmul.f32 %v3151_v9, %v2185_v42  ;;  %v3081_v42 = vld [vmem:[%s3898_s6 + $0x18] sm:$0xff]  }
0x153d   :  { %v2192_v23 = vadd.f32 0.2548296, %v2188_v39  ;;  %v2190_v52 = vmul.f32 %v3153_v16, %v2186_v14  ;;  %v3078_v39 = vld [vmem:[%s3898_s6] sm:$0xff]  }
0x153e   :  { %v2195_v44 = vmul.f32 %v3147_v56, %v2191_v41  ;;  %v2193_v51 = vadd.f32 0.2548296, %v2189_v24  ;;  %2877 = vmatpush3.bf16.msra.mxu0 %v3078_v39  ;;  %v3080_v41 = vld [vmem:[%s3898_s6 + $0x10] sm:$0xff]   ;;  %v2687_v14 = vld [vmem:[%s3899_s7] ss:$0 sm:$0xff] }
0x153f   :  { %v2196_v61 = vmul.f32 %v3149_v2, %v2192_v23  ;;  %v2194_v21 = vadd.f32 0.2548296, %v2190_v52  ;;  %2878 = vmatprep.subr.bf16.mxu0 %v3193_v46 }
0x1540   :  { %v2215_v49 = vmul.f32 %v3155_v45, %v2195_v44  ;;  %v2197_v7 = vmul.f32 %v3151_v9, %v2193_v51 }
0x1541   :  { %v2216_v53 = vmul.f32 %v3157_v38, %v2196_v61  ;;  %v2198_v4 = vmul.f32 %v3153_v16, %v2194_v21  ;;  %v2129_v16 = vmul.f32 0.5, %v3820_v10  ;;  %v2688_v61 = vld [vmem:[%s3899_s7 + $0x1] ss:$0 sm:$0xff] }
0x1542   :  { %v2219_v18 = vsub.f32 1.0, %v2215_v49  ;;  %v2217_v2 = vmul.f32 %v3159_v60, %v2197_v7 }
0x1543   :  { %v2220_v56 = vsub.f32 1.0, %v2216_v53  ;;  %v2218_v6 = vmul.f32 %v3161_v58, %v2198_v4 }
0x1544   :  { %v2223_v54 = vmul.f32 %v2219_v18, %v2139_v3  ;;  %v2221_v5 = vsub.f32 1.0, %v2217_v2 }
0x1545   :  { %v2224_v8 = vmul.f32 %v2220_v56, %v2140_v59  ;;  %v2222_v12 = vsub.f32 1.0, %v2218_v6 }
0x1546   :  { %v2227_v9 = vadd.f32 1.0, %v2223_v54  ;;  %v2225_v55 = vmul.f32 %v2221_v5, %v2141_v43 }
0x1547   :  { %v2228_v0 = vadd.f32 1.0, %v2224_v8  ;;  %v2226_v20 = vmul.f32 %v2222_v12, %v2142_v22 }
0x1548   :  { %v2229_v17 = vadd.f32 1.0, %v2225_v55  ;;  %v2231_v48 = vmul.f32 %v2227_v9, %v2127_v15 }
0x1549   :  { %v2230_v29 = vadd.f32 1.0, %v2226_v20  ;;  %v2232_v30 = vmul.f32 %v2228_v0, %v2128_v26 }
0x154a   :  { %v2233_v27 = vmul.f32 %v2229_v17, %v2129_v16 }
0x154b   :  { %v2234_v31 = vmul.f32 %v2230_v29, %v2130_v47 }
0x154c   :  { %v2235_v50 = vpack.c.bf16 %v2233_v27, %v2231_v48 }
0x154d   :  { %v2236_v19 = vpack.c.bf16 %v2234_v31, %v2232_v30 }
0x154f   :  { %2365 = vmatprep.mubr.bf16.mxu1 %v2236_v19 }
0x1550   :  { %2366 = vmatmul.mubr.bf16.vlgmr.msra.gmra.mrb[36].mxu1 %v2235_v50 }
0x1623   :  { %v2777_v1 = vpop.f32.mrb[36].mxu1 }
0x1624   :  { %v2778_v34 = vpop.f32.mrb[37].mxu1 }
0x1625   :  { %v2779_v32 = vadd.f32 %v2778_v34, %v2777_v1  ;;  %v2780_v33 = vpop.f32.mrb[38].mxu1 }
0x1626   :  { %v2781_v10 = vpop.f32.mrb[39].mxu1 }
0x1627   :  { %v2373_v11 = vadd.f32 %v2779_v32, %v3717_v57  ;;  %v3079_v57 = vld [vmem:[%s3898_s6 + $0x8] sm:$0xff]  }
0x1628   :  { %2879 = vmatpush3.bf16.msra.mxu0 %v3079_v57 }
0x1629   :  { %v2374_v13 = vadd.f32 %v2624_v40, %v2373_v11  ;;  %2880 = vmatprep.subr.bf16.mxu0 %v3193_v46 }
0x162b   :  { %v2378_v63 = vsel %vm246_vm1, %v2374_v13, 0.0 }
0x162c   :  { %2379 = vadd.xlane.f32.xlu0 %v2378_v63  ;;  %2881 = vmatpush3.bf16.msra.mxu0 %v3080_v41 }
0x162d   :  { %2882 = vmatprep.subr.bf16.mxu0 %v3193_v46  ;;  %v2689_v46 = vld [vmem:[%s3899_s7 + $0x2] ss:$0 sm:$0xff] }
0x1630   :  { %2883 = vmatpush3.bf16.msra.mxu0 %v3081_v42 }
0x16b9   :  { %v2380_v25 = vpop.xlane.xlu0 %2379 }
0x16ba   :  { %v2381_v35 = vmul.f32 0.015625, %v2380_v25 }
0x16bc   :  { %v2382_v36 = vsub.f32 %v2374_v13, %v2381_v35 }
0x16be   :  { %v2383_v28 = vmul.f32 %v2382_v36, %v2382_v36 }
0x16c0   :  { %v2384_v37 = vsel %vm246_vm1, %v2383_v28, 0.0 }
0x16c1   :  { %2385 = vadd.xlane.f32.xlu1 %v2384_v37 }
0x174e   :  { %v2386_v62 = vpop.xlane.xlu1 %2385 }
0x174f   :  { %v2387_v23 = vmul.f32 0.015625, %v2386_v62 }
0x1751   :  { %v2388_v44 = vadd.f32 1e-06, %v2387_v23 }
0x1753   :  { %3162 = vrsqrt.f32 %v2388_v44 }
0x175d   :  { %v3163_v24 = vpop.eup %3162 }
0x175e   :  { %v2390_v45 = vmul.f32 %v3163_v24, %v2382_v36 }
0x1760   :  { %v2395_v38 = vmul.f32 %v2687_v14, %v2390_v45 }
0x1762   :  { %v2400_v49 = vadd.f32 %v2688_v61, %v2395_v38 }
0x1764   :  { %v2401_v51 = vpack.c.bf16 %v2400_v49, %v2400_v49 }
0x1766   :  { %2885 = vmatmul.mubr.msk.bf16.vlgmr.msra.gmra.mrb[24].mxu0 %vm140_vm0, %v2401_v51 }
0x1839   :  { %v2475_v52 = vpop.f32.mrb[24].mxu0 }
0x183a   :  { %v2476_v53 = vadd.f32 %v2689_v46, %v2475_v52  ;;  %v2886_v18 = vpop.f32.mrb[25].mxu0 }
0x183b   :  { %v2478_v7 = vpop.f32.mrb[26].mxu0 }
0x183c   :  { %2481 = vst [vmem:[#allocation2] sm:$0x3] %v2476_v53  ;;  %v2887_v21 = vpop.f32.mrb[27].mxu0 }
0x183d   :  { %3175 = shalt.err (!%p3172_p4)
}
0x183e   :  { %s3176_s7 = scalar_lea.hbm %s3900_s8, 32 }
0x183f   :  { %p3177_p5 = scmp.ne.s32.totalorder %s3900_s8, %s3176_s7  ;;  %p3180_p6 = scmp.lt.u32.totalorder %s3176_s7, %s3900_s8 }
0x1841   :  { %p3182_p7 = pnand %p3180_p6, %p3177_p5 }
0x1843   :  { %3185 = shalt.err (!%p3182_p7)
}
0x1844   :  { %2491 = dma.vmem_to_hbm [thread:$0]  %s2489_s13, 32, %s3900_s8, [#allocation3]  }
0x1845   :  { %3186 = dma.done.wait [#allocation3], 32  }
0x1846   :  { %3187 = vsyncadd [#allocation3], 4294967264 }
0x1847   :  { %2495 = vsyncpa [#allocation3], 1 }

</bundles_post_ra>
